<compile_context>
chip_gen: v7x
topology: tpu7x:2x2x1
jax: 0.10.0
libtpu: 0.0.40
codegen_flags: <defaults>
</compile_context>

<pallas_src>
import functools

import jax
import jax.numpy as jnp
from jax import lax
from jax.experimental import pallas as pl
from jax.experimental.pallas import tpu as pltpu


# Above the v5e (16 MiB) / v6e (32 MiB) scoped defaults, below v7x's 64 MiB physical VMEM.
_VMEM_LIMIT_BYTES = 48 * 1024 * 1024


# ----------------------------------------------------------------------------
# Pallas kernel 1 (fused RBF):  Ku = k(Z, Z)    (written once, resident block)
#                               Kuf[:, tile] = k(Z, X_tile)   (lane-dense (M, N) output)
#   k(a, b) = exp(amp - max(||a/l - b/l||^2, 0))
# ----------------------------------------------------------------------------
def _rbf_fused_body(ls_ref, amp_ref, z_ref, x_ref, ku_ref, kuf_ref):
    inv_l = jnp.exp(-ls_ref[0])
    amp = amp_ref[0]

    z = z_ref[...] * inv_l                                       # (M, Din)
    zsq_col = jnp.sum(z * z, axis=-1, keepdims=True)             # (M, 1)
    zsq_row = jnp.sum(z * z, axis=-1)[None, :]                   # (1, M)

    # Ku only depends on Z: compute it once; its output block is revisited (resident).
    @pl.when(pl.program_id(0) == 0)
    def _():
        cross_zz = lax.dot_general(z, z, (((1,), (1,)), ((), ())),
                                   preferred_element_type=jnp.float32)     # (M, M)
        dzz = jnp.maximum(zsq_col + zsq_row - 2.0 * cross_zz, 0.0)
        ku_ref[...] = jnp.exp(amp - dzz)

    x = x_ref[...] * inv_l                                       # (tile_n, Din)
    xsq_row = jnp.sum(x * x, axis=-1)[None, :]                   # (1, tile_n)
    cross = lax.dot_general(z, x, (((1,), (1,)), ((), ())),
                            preferred_element_type=jnp.float32)  # (M, tile_n)
    dist = jnp.maximum(zsq_col + xsq_row - 2.0 * cross, 0.0)
    kuf_ref[...] = jnp.exp(amp - dist)                           # fused exp(amp)*exp(-dist)


def rbf_ku_kuf(Z, Xp, ls, amp, *, tile_n):
    m, din = Z.shape
    n_pad = Xp.shape[0]
    n_tiles = n_pad // tile_n
    return pl.pallas_call(
        _rbf_fused_body,
        out_shape=(jax.ShapeDtypeStruct((m, m), jnp.float32),       # Ku (no jitter yet)
                   jax.ShapeDtypeStruct((m, n_pad), jnp.float32)),  # Kuf = k(Z, X)
        grid_spec=pltpu.PrefetchScalarGridSpec(
            num_scalar_prefetch=0,
            grid=(n_tiles,),
            in_specs=[
                pl.BlockSpec(memory_space=pltpu.MemorySpace.SMEM),   # log_lengthscale (1,)
                pl.BlockSpec(memory_space=pltpu.MemorySpace.SMEM),   # log_amplitude  (1,)
                pl.BlockSpec((m, din), lambda i: (0, 0)),            # Z resident
                pl.BlockSpec((tile_n, din), lambda i: (i, 0)),       # X tile
            ],
            out_specs=(
                pl.BlockSpec((m, m), lambda i: (0, 0)),              # Ku (revisited block)
                pl.BlockSpec((m, tile_n), lambda i: (0, i)),         # Kuf tile (lane-dense)
            ),
        ),
        compiler_params=pltpu.CompilerParams(
            # Ku's output block is revisited across the N axis -> keep this axis "arbitrary".
            dimension_semantics=("arbitrary",),
            vmem_limit_bytes=_VMEM_LIMIT_BYTES),
    )(ls, amp, Z, Xp)


# ----------------------------------------------------------------------------
# Pallas kernel 2 (posterior), everything in the transposed (lane-dense) domain:
#   mean^T[d, n] = sum_m q_mu[m, d] * At[m, n]
#   delta[d, n]  = sum_k (L_d^T a_n)_k^2 - a_n^T Ku a_n
#   K[d, n]      = (exp(amp) + 2e-6) + delta[d, n]
# ----------------------------------------------------------------------------
def _posterior_body(amp_ref, at_ref, qmu_t_ref, lt_ref, ku_ref, mean_ref, k_ref,
                    *, output_dim):
    At = at_ref[...]                                             # (M, tile_n) = A^T tile
    Ku = ku_ref[...]                                             # (M, M)

    # Lane-dense mean^T written as one (D, tile_n) block.
    mean_ref[...] = jnp.dot(qmu_t_ref[...], At,
                            preferred_element_type=jnp.float32)  # (D, tile_n)

    # a_n^T Ku a_n, hoisted out of the per-output loop.
    ku_at = jnp.dot(Ku, At, preferred_element_type=jnp.float32)  # (M, tile_n)
    base = jnp.sum(ku_at * At, axis=0, keepdims=True)            # (1, tile_n)

    kf_diag = jnp.exp(amp_ref[0]) + 2e-6                         # diag of k(X,X) + 2e-6*I

    # Small static D; per-output state is a single (M, tile_n) temporary (no L@L^T, no SK).
    rows = []
    for d in range(output_dim):
        lt_at = jnp.dot(lt_ref[d], At,
                        preferred_element_type=jnp.float32)      # (M, tile_n) = L_d^T A^T
        rows.append(jnp.sum(lt_at * lt_at, axis=0, keepdims=True))  # (1, tile_n)
    t1 = rows[0] if output_dim == 1 else jnp.concatenate(rows, axis=0)   # (D, tile_n)

    # One dense (D, tile_n) store instead of D masked row stores.
    k_ref[...] = kf_diag + (t1 - base)


def posterior(At, q_mu_t, Lt_stack, Ku, amp, *, tile_n):
    m, n_pad = At.shape
    d = q_mu_t.shape[0]
    n_tiles = n_pad // tile_n
    body = functools.partial(_posterior_body, output_dim=d)
    return pl.pallas_call(
        body,
        out_shape=(jax.ShapeDtypeStruct((d, n_pad), jnp.float32),   # mean^T
                   jax.ShapeDtypeStruct((d, n_pad), jnp.float32)),  # K
        grid_spec=pltpu.PrefetchScalarGridSpec(
            num_scalar_prefetch=0,
            grid=(n_tiles,),
            in_specs=[
                pl.BlockSpec(memory_space=pltpu.MemorySpace.SMEM),   # log_amplitude (1,)
                pl.BlockSpec((m, tile_n), lambda i: (0, i)),         # A^T tile (lane-dense)
                pl.BlockSpec((d, m), lambda i: (0, 0)),              # q_mu^T resident
                pl.BlockSpec((d, m, m), lambda i: (0, 0, 0)),        # L^T stack resident
                pl.BlockSpec((m, m), lambda i: (0, 0)),              # Ku resident
            ],
            out_specs=(
                pl.BlockSpec((d, tile_n), lambda i: (0, i)),
                pl.BlockSpec((d, tile_n), lambda i: (0, i)),
            ),
        ),
        compiler_params=pltpu.CompilerParams(
            dimension_semantics=("parallel",),                       # megacore over N tiles
            vmem_limit_bytes=_VMEM_LIMIT_BYTES),
    )(amp, At, q_mu_t, Lt_stack, Ku)


# ----------------------------------------------------------------------------
# SparseGP.forward (log_layer_noise=None, mean_function=None, return_prior_samples=False)
# ----------------------------------------------------------------------------
def sparse_gp_forward(X, Z, q_mu, q_sqrt_tri, log_lengthscale, log_amplitude, *, tile_n=256):
    # tile_n: rows of X per grid step. 256 stays comfortably within v7x's 64 MiB VMEM for
    # moderate M; on v5e/v6e (128 MiB) it can be raised toward 512 for large N.
    assert tile_n % 128 == 0, "tile_n must be a multiple of 128 (lane width)"
    n = X.shape[0]
    m = Z.shape[0]
    d = q_mu.shape[1]

    X = X.astype(jnp.float32)
    Z = Z.astype(jnp.float32)
    q_mu = q_mu.astype(jnp.float32)
    q_sqrt_tri = q_sqrt_tri.astype(jnp.float32)
    ls = jnp.reshape(log_lengthscale, (1,)).astype(jnp.float32)
    amp = jnp.reshape(log_amplitude, (1,)).astype(jnp.float32)

    # Choose N tiling: single full-size tile when it fits, else 128-aligned tiles + padding.
    if n <= tile_n:
        tn, n_pad = n, n
    else:
        tn = tile_n
        n_pad = ((n + tn - 1) // tn) * tn
    Xp = jnp.pad(X, ((0, n_pad - n), (0, 0))) if n_pad != n else X

    ku_raw, kuf = rbf_ku_kuf(Z, Xp, ls, amp, tile_n=tn)
    Ku = ku_raw + 2e-6 * jnp.eye(m, dtype=jnp.float32)

    # TODO(synk): Cholesky / triangular solve have no Pallas TPU primitive; kept in plain JAX.
    Lu = jnp.linalg.cholesky(Ku + 1e-4 * jnp.eye(m, dtype=jnp.float32))
    # A^T = (Lu Lu^T)^{-1} Kuf, shape (M, N): working transposed keeps the posterior kernel's
    # inputs/outputs lane-dense and avoids any wrapper-side transpose of Kfu.
    At = jax.scipy.linalg.solve_triangular(Lu, kuf, lower=True)
    At = jax.scipy.linalg.solve_triangular(Lu.T, At, lower=False)

    # Dense lower-triangular q_sqrt from its packed parameterization.
    li, lj = jnp.tril_indices(m)
    q_sqrt = jnp.zeros((m, m, d), dtype=jnp.float32).at[li, lj].set(q_sqrt_tri)
    Lt_stack = jnp.transpose(q_sqrt, (2, 1, 0))                  # (D, M, M); Lt_stack[d] = L_d^T
    q_mu_t = q_mu.T                                              # (D, M)

    mean_t, K = posterior(At, q_mu_t, Lt_stack, Ku, amp, tile_n=tn)
    return mean_t[:, :n].T, K[:, :n]


# ----------------------------------------------------------------------------
# Pure-JAX reference mirroring the PyTorch forward (in-script sanity check).
# ----------------------------------------------------------------------------
def _kernel_ref(x1, x2, ls, amp):
    x1_ = x1 / jnp.exp(ls)
    x2_ = x2 / jnp.exp(ls)
    dist = jnp.sum((x1_[:, None, :] - x2_[None, :, :]) ** 2, -1)
    return jnp.exp(amp) * jnp.exp(-dist)


def reference_forward(X, Z, q_mu, q_sqrt_tri, ls, amp):
    M, N, D = Z.shape[0], X.shape[0], q_mu.shape[1]
    Ku = _kernel_ref(Z, Z, ls, amp) + 2e-6 * jnp.eye(M)
    Kf = _kernel_ref(X, X, ls, amp) + 2e-6 * jnp.eye(N)
    Kfu = _kernel_ref(X, Z, ls, amp)
    Lu = jnp.linalg.cholesky(Ku + 1e-4 * jnp.eye(M))
    A = jax.scipy.linalg.solve_triangular(Lu, Kfu.T, lower=True).T
    A = jax.scipy.linalg.solve_triangular(Lu.T, A.T, lower=False).T
    mean = A @ q_mu
    li, lj = jnp.tril_indices(M)
    q_sqrt = jnp.zeros((M, M, D)).at[li, lj].set(q_sqrt_tri)
    SK = jnp.einsum('nmd,bmd->dnb', q_sqrt, q_sqrt) - Ku[None]
    B = jnp.einsum('dmb,nb->dmn', SK, A)
    delta_cov = jnp.sum(A[None] * jnp.transpose(B, (0, 2, 1)), -1)
    K = jnp.diag(Kf)[None, :] + delta_cov
    return mean, K


if __name__ == "__main__":
    key = jax.random.PRNGKey(0)
    k1, k2, k3, k4 = jax.random.split(key, 4)

    # Small shapes: N rows, 4 features, 16 inducing points, 3 outputs.
    N, input_dim, M, D = 200, 4, 16, 3

    X = jax.random.normal(k1, (N, input_dim), dtype=jnp.float32)
    Z = jax.random.normal(k2, (M, input_dim), dtype=jnp.float32)     # inducing_points param

    # Parameters: module defaults are q_mu=0 / q_sqrt=I / log params=0; small deterministic
    # perturbations make the mean matmul and the L-path nontrivial.
    q_mu = 0.1 * jax.random.normal(k3, (M, D), dtype=jnp.float32)
    li, lj = jnp.tril_indices(M)
    eye_tri = jnp.where(li == lj, 1.0, 0.0).astype(jnp.float32)      # packed tril of I
    q_sqrt_tri = (jnp.tile(eye_tri[:, None], (1, D))
                  + 0.05 * jax.random.normal(k4, (eye_tri.shape[0], D), dtype=jnp.float32))
    log_lengthscale = jnp.float32(0.0)
    log_amplitude = jnp.float32(0.0)

    # tile_n=128 so the N=200 batch exercises the padded, multi-tile grid path (2 tiles).
    fwd = jax.jit(functools.partial(sparse_gp_forward, tile_n=128))
    mean, K = fwd(X, Z, q_mu, q_sqrt_tri, log_lengthscale, log_amplitude)
    mean = jax.block_until_ready(mean)
    K = jax.block_until_ready(K)

    mean_ref, K_ref = reference_forward(X, Z, q_mu, q_sqrt_tri,
                                        log_lengthscale, log_amplitude)
    assert mean.shape == (N, D) and K.shape == (D, N)
    assert jnp.allclose(mean, mean_ref, atol=2e-3, rtol=2e-3)
    assert jnp.allclose(K, K_ref, atol=2e-3, rtol=2e-3)
    print("KERNEL_OK")
</pallas_src>

<mosaic_0001>
module attributes {stable_mosaic.version = 11 : i64} {
  func.func private @main(%arg0: i32) attributes {dimension_semantics = [#tpu.dimension_semantics<core_parallel>], iteration_bounds = array<i64: 2>, tpu.core_type = #tpu.core_type<sc_scalar_subcore>, window_params = []} {
    return
  }
}

module attributes {stable_mosaic.version = 11 : i64} {
  func.func private @main(%arg0: i32) attributes {dimension_semantics = [#tpu.dimension_semantics<core_parallel>], iteration_bounds = array<i64: 2>, tpu.core_type = #tpu.core_type<sc_scalar_subcore>, window_params = []} {
    return
  }
}

module attributes {stable_mosaic.version = 11 : i64} {
  func.func @_rbf_fused_body(%arg0: i32, %arg1: memref<1xf32, #tpu.memory_space<smem>>, %arg2: memref<1xf32, #tpu.memory_space<smem>>, %arg3: memref<16x4xf32, #tpu.memory_space<vmem>>, %arg4: memref<128x4xf32, #tpu.memory_space<vmem>>, %arg5: memref<16x16xf32, #tpu.memory_space<vmem>>, %arg6: memref<16x128xf32, #tpu.memory_space<vmem>>) attributes {dimension_semantics = [#tpu.dimension_semantics<arbitrary>], iteration_bounds = array<i64: 2>, scalar_prefetch = 0 : i64, scratch_operands = 0 : i64, tpu.core_type = #tpu.core_type<tc>, window_params = [{transform_indices = @transform_0, window_bounds = array<i64: 1>}, {transform_indices = @transform_1, window_bounds = array<i64: 1>}, {pipeline_mode = #tpu.pipeline_mode<synchronous>, transform_indices = @transform_2, window_bounds = array<i64: 16, 4>}, {transform_indices = @transform_3, window_bounds = array<i64: 128, 4>}, {pipeline_mode = #tpu.pipeline_mode<synchronous>, transform_indices = @transform_4, window_bounds = array<i64: 16, 16>}, {transform_indices = @transform_5, window_bounds = array<i64: 16, 128>}]} {
    %c0 = arith.constant 0 : index
    %0 = memref.load %arg1[%c0] : memref<1xf32, #tpu.memory_space<smem>>
    %cst = arith.constant 0.000000e+00 : f32
    %1 = arith.subf %cst, %0 : f32
    %2 = math.exp %1 : f32
    %c0_0 = arith.constant 0 : index
    %3 = memref.load %arg2[%c0_0] : memref<1xf32, #tpu.memory_space<smem>>
    %c0_1 = arith.constant 0 : index
    %c0_2 = arith.constant 0 : index
    %4 = vector.load %arg3[%c0_1, %c0_2] : memref<16x4xf32, #tpu.memory_space<vmem>>, vector<16x4xf32>
    %5 = vector.broadcast %2 : f32 to vector<16x4xf32>
    %6 = arith.mulf %4, %5 : vector<16x4xf32>
    %7 = arith.mulf %6, %6 : vector<16x4xf32>
    %cst_3 = arith.constant dense<0.000000e+00> : vector<16xf32>
    %8 = vector.multi_reduction <add>, %7, %cst_3 [1] : vector<16x4xf32> to vector<16xf32>
    %9 = vector.shape_cast %8 : vector<16xf32> to vector<16x1xf32>
    %10 = arith.mulf %6, %6 : vector<16x4xf32>
    %cst_4 = arith.constant dense<0.000000e+00> : vector<16xf32>
    %11 = vector.multi_reduction <add>, %10, %cst_4 [1] : vector<16x4xf32> to vector<16xf32>
    %12 = vector.shape_cast %11 : vector<16xf32> to vector<1x16xf32>
    %c0_i32 = arith.constant 0 : i32
    %13 = arith.cmpi eq, %arg0, %c0_i32 : i32
    %14 = arith.extui %13 : i1 to i32
    %c0_i32_5 = arith.constant 0 : i32
    %15 = arith.cmpi ne, %14, %c0_i32_5 : i32
    scf.if %15 {
      %cst_14 = arith.constant dense<0.000000e+00> : vector<16x16xf32>
      %35 = tpu.matmul %6, %6, %cst_14 {dimension_numbers = #tpu.dot_dimension_numbers<[1], [1], [0], [0], [0, 0, 1, 0], [], []>} : vector<16x4xf32>, vector<16x4xf32>, vector<16x16xf32> -> vector<16x16xf32>
      %36 = vector.broadcast %9 : vector<16x1xf32> to vector<16x16xf32>
      %37 = vector.broadcast %12 : vector<1x16xf32> to vector<16x16xf32>
      %38 = arith.addf %36, %37 : vector<16x16xf32>
      %cst_15 = arith.constant 2.000000e+00 : f32
      %39 = vector.broadcast %cst_15 : f32 to vector<16x16xf32>
      %40 = arith.mulf %39, %35 : vector<16x16xf32>
      %41 = arith.subf %38, %40 : vector<16x16xf32>
      %cst_16 = arith.constant 0.000000e+00 : f32
      %42 = vector.broadcast %cst_16 : f32 to vector<16x16xf32>
      %43 = arith.maximumf %41, %42 : vector<16x16xf32>
      %44 = vector.broadcast %3 : f32 to vector<16x16xf32>
      %45 = arith.subf %44, %43 : vector<16x16xf32>
      %46 = math.exp %45 : vector<16x16xf32>
      %c0_17 = arith.constant 0 : index
      %c0_18 = arith.constant 0 : index
      %47 = vector.load %arg5[%c0_17, %c0_18] : memref<16x16xf32, #tpu.memory_space<vmem>>, vector<16x16xf32>
      tpu.vector_store %arg5[%c0_17, %c0_18], %46 {strides = array<i32>} : memref<16x16xf32, #tpu.memory_space<vmem>>, vector<16x16xf32>,
    } else {
    }
    %c0_6 = arith.constant 0 : index
    %c0_7 = arith.constant 0 : index
    %16 = vector.load %arg4[%c0_6, %c0_7] : memref<128x4xf32, #tpu.memory_space<vmem>>, vector<128x4xf32>
    %17 = vector.broadcast %2 : f32 to vector<128x4xf32>
    %18 = arith.mulf %16, %17 : vector<128x4xf32>
    %19 = arith.mulf %18, %18 : vector<128x4xf32>
    %cst_8 = arith.constant dense<0.000000e+00> : vector<128xf32>
    %20 = vector.multi_reduction <add>, %19, %cst_8 [1] : vector<128x4xf32> to vector<128xf32>
    %21 = vector.shape_cast %20 : vector<128xf32> to vector<1x128xf32>
    %cst_9 = arith.constant dense<0.000000e+00> : vector<16x128xf32>
    %22 = tpu.matmul %6, %18, %cst_9 {dimension_numbers = #tpu.dot_dimension_numbers<[1], [1], [0], [0], [0, 0, 1, 0], [], []>} : vector<16x4xf32>, vector<128x4xf32>, vector<16x128xf32> -> vector<16x128xf32>
    %23 = vector.broadcast %9 : vector<16x1xf32> to vector<16x128xf32>
    %24 = vector.broadcast %21 : vector<1x128xf32> to vector<16x128xf32>
    %25 = arith.addf %23, %24 : vector<16x128xf32>
    %cst_10 = arith.constant 2.000000e+00 : f32
    %26 = vector.broadcast %cst_10 : f32 to vector<16x128xf32>
    %27 = arith.mulf %26, %22 : vector<16x128xf32>
    %28 = arith.subf %25, %27 : vector<16x128xf32>
    %cst_11 = arith.constant 0.000000e+00 : f32
    %29 = vector.broadcast %cst_11 : f32 to vector<16x128xf32>
    %30 = arith.maximumf %28, %29 : vector<16x128xf32>
    %31 = vector.broadcast %3 : f32 to vector<16x128xf32>
    %32 = arith.subf %31, %30 : vector<16x128xf32>
    %33 = math.exp %32 : vector<16x128xf32>
    %c0_12 = arith.constant 0 : index
    %c0_13 = arith.constant 0 : index
    %34 = vector.load %arg6[%c0_12, %c0_13] : memref<16x128xf32, #tpu.memory_space<vmem>>, vector<16x128xf32>
    tpu.vector_store %arg6[%c0_12, %c0_13], %33 {strides = array<i32>} : memref<16x128xf32, #tpu.memory_space<vmem>>, vector<16x128xf32>,
    return
  }
  func.func @transform_0(%arg0: i32) -> i32 {
    %c0_i32 = arith.constant 0 : i32
    %c0_i32_0 = arith.constant 0 : i32
    return %c0_i32 : i32
  }
  func.func @transform_1(%arg0: i32) -> i32 {
    %c0_i32 = arith.constant 0 : i32
    %c0_i32_0 = arith.constant 0 : i32
    return %c0_i32 : i32
  }
  func.func @transform_2(%arg0: i32) -> (i32, i32) {
    %c0_i32 = arith.constant 0 : i32
    %c0_i32_0 = arith.constant 0 : i32
    %c0_i32_1 = arith.constant 0 : i32
    return %c0_i32, %c0_i32_0 : i32, i32
  }
  func.func @transform_3(%arg0: i32) -> (i32, i32) {
    %c0_i32 = arith.constant 0 : i32
    %c0_i32_0 = arith.constant 0 : i32
    return %arg0, %c0_i32 : i32, i32
  }
  func.func @transform_4(%arg0: i32) -> (i32, i32) {
    %c0_i32 = arith.constant 0 : i32
    %c0_i32_0 = arith.constant 0 : i32
    %c0_i32_1 = arith.constant 0 : i32
    return %c0_i32, %c0_i32_0 : i32, i32
  }
  func.func @transform_5(%arg0: i32) -> (i32, i32) {
    %c0_i32 = arith.constant 0 : i32
    %c0_i32_0 = arith.constant 0 : i32
    return %c0_i32, %arg0 : i32, i32
  }
}

module attributes {stable_mosaic.version = 11 : i64} {
  func.func @_posterior_body(%arg0: i32, %arg1: memref<1xf32, #tpu.memory_space<smem>>, %arg2: memref<16x128xf32, #tpu.memory_space<vmem>>, %arg3: memref<3x16xf32, #tpu.memory_space<vmem>>, %arg4: memref<3x16x16xf32, #tpu.memory_space<vmem>>, %arg5: memref<16x16xf32, #tpu.memory_space<vmem>>, %arg6: memref<3x128xf32, #tpu.memory_space<vmem>>, %arg7: memref<3x128xf32, #tpu.memory_space<vmem>>) attributes {dimension_semantics = [#tpu.dimension_semantics<parallel>], iteration_bounds = array<i64: 2>, scalar_prefetch = 0 : i64, scratch_operands = 0 : i64, tpu.core_type = #tpu.core_type<tc>, window_params = [{transform_indices = @transform_0, window_bounds = array<i64: 1>}, {transform_indices = @transform_1, window_bounds = array<i64: 16, 128>}, {pipeline_mode = #tpu.pipeline_mode<synchronous>, transform_indices = @transform_2, window_bounds = array<i64: 3, 16>}, {pipeline_mode = #tpu.pipeline_mode<synchronous>, transform_indices = @transform_3, window_bounds = array<i64: 3, 16, 16>}, {pipeline_mode = #tpu.pipeline_mode<synchronous>, transform_indices = @transform_4, window_bounds = array<i64: 16, 16>}, {transform_indices = @transform_5, window_bounds = array<i64: 3, 128>}, {transform_indices = @transform_6, window_bounds = array<i64: 3, 128>}]} {
    %c0 = arith.constant 0 : index
    %c0_0 = arith.constant 0 : index
    %0 = vector.load %arg2[%c0, %c0_0] : memref<16x128xf32, #tpu.memory_space<vmem>>, vector<16x128xf32>
    %c0_1 = arith.constant 0 : index
    %c0_2 = arith.constant 0 : index
    %1 = vector.load %arg5[%c0_1, %c0_2] : memref<16x16xf32, #tpu.memory_space<vmem>>, vector<16x16xf32>
    %c0_3 = arith.constant 0 : index
    %c0_4 = arith.constant 0 : index
    %2 = vector.load %arg3[%c0_3, %c0_4] : memref<3x16xf32, #tpu.memory_space<vmem>>, vector<3x16xf32>
    %cst = arith.constant dense<0.000000e+00> : vector<3x128xf32>
    %3 = tpu.matmul %2, %0, %cst {dimension_numbers = #tpu.dot_dimension_numbers<[1], [0], [0], [1], [0, 0, 1, 1], [], []>} : vector<3x16xf32>, vector<16x128xf32>, vector<3x128xf32> -> vector<3x128xf32>
    %c0_5 = arith.constant 0 : index
    %c0_6 = arith.constant 0 : index
    %4 = vector.load %arg6[%c0_5, %c0_6] : memref<3x128xf32, #tpu.memory_space<vmem>>, vector<3x128xf32>
    tpu.vector_store %arg6[%c0_5, %c0_6], %3 {strides = array<i32>} : memref<3x128xf32, #tpu.memory_space<vmem>>, vector<3x128xf32>,
    %cst_7 = arith.constant dense<0.000000e+00> : vector<16x128xf32>
    %5 = tpu.matmul %1, %0, %cst_7 {dimension_numbers = #tpu.dot_dimension_numbers<[1], [0], [0], [1], [0, 0, 1, 1], [], []>} : vector<16x16xf32>, vector<16x128xf32>, vector<16x128xf32> -> vector<16x128xf32>
    %6 = arith.mulf %5, %0 : vector<16x128xf32>
    %cst_8 = arith.constant dense<0.000000e+00> : vector<128xf32>
    %7 = vector.multi_reduction <add>, %6, %cst_8 [0] : vector<16x128xf32> to vector<128xf32>
    %8 = vector.shape_cast %7 : vector<128xf32> to vector<1x128xf32>
    %c0_9 = arith.constant 0 : index
    %9 = memref.load %arg1[%c0_9] : memref<1xf32, #tpu.memory_space<smem>>
    %10 = math.exp %9 : f32
    %cst_10 = arith.constant 2.000000e-06 : f32
    %11 = arith.addf %10, %cst_10 : f32
    %c0_11 = arith.constant 0 : index
    %c0_12 = arith.constant 0 : index
    %c0_13 = arith.constant 0 : index
    %12 = vector.load %arg4[%c0_11, %c0_12, %c0_13] : memref<3x16x16xf32, #tpu.memory_space<vmem>>, vector<1x16x16xf32>
    %13 = vector.shape_cast %12 : vector<1x16x16xf32> to vector<16x16xf32>
    %cst_14 = arith.constant dense<0.000000e+00> : vector<16x128xf32>
    %14 = tpu.matmul %13, %0, %cst_14 {dimension_numbers = #tpu.dot_dimension_numbers<[1], [0], [0], [1], [0, 0, 1, 1], [], []>} : vector<16x16xf32>, vector<16x128xf32>, vector<16x128xf32> -> vector<16x128xf32>
    %15 = arith.mulf %14, %14 : vector<16x128xf32>
    %cst_15 = arith.constant dense<0.000000e+00> : vector<128xf32>
    %16 = vector.multi_reduction <add>, %15, %cst_15 [0] : vector<16x128xf32> to vector<128xf32>
    %17 = vector.shape_cast %16 : vector<128xf32> to vector<1x128xf32>
    %c1 = arith.constant 1 : index
    %c0_16 = arith.constant 0 : index
    %c0_17 = arith.constant 0 : index
    %18 = vector.load %arg4[%c1, %c0_16, %c0_17] : memref<3x16x16xf32, #tpu.memory_space<vmem>>, vector<1x16x16xf32>
    %19 = vector.shape_cast %18 : vector<1x16x16xf32> to vector<16x16xf32>
    %cst_18 = arith.constant dense<0.000000e+00> : vector<16x128xf32>
    %20 = tpu.matmul %19, %0, %cst_18 {dimension_numbers = #tpu.dot_dimension_numbers<[1], [0], [0], [1], [0, 0, 1, 1], [], []>} : vector<16x16xf32>, vector<16x128xf32>, vector<16x128xf32> -> vector<16x128xf32>
    %21 = arith.mulf %20, %20 : vector<16x128xf32>
    %cst_19 = arith.constant dense<0.000000e+00> : vector<128xf32>
    %22 = vector.multi_reduction <add>, %21, %cst_19 [0] : vector<16x128xf32> to vector<128xf32>
    %23 = vector.shape_cast %22 : vector<128xf32> to vector<1x128xf32>
    %c2 = arith.constant 2 : index
    %c0_20 = arith.constant 0 : index
    %c0_21 = arith.constant 0 : index
    %24 = vector.load %arg4[%c2, %c0_20, %c0_21] : memref<3x16x16xf32, #tpu.memory_space<vmem>>, vector<1x16x16xf32>
    %25 = vector.shape_cast %24 : vector<1x16x16xf32> to vector<16x16xf32>
    %cst_22 = arith.constant dense<0.000000e+00> : vector<16x128xf32>
    %26 = tpu.matmul %25, %0, %cst_22 {dimension_numbers = #tpu.dot_dimension_numbers<[1], [0], [0], [1], [0, 0, 1, 1], [], []>} : vector<16x16xf32>, vector<16x128xf32>, vector<16x128xf32> -> vector<16x128xf32>
    %27 = arith.mulf %26, %26 : vector<16x128xf32>
    %cst_23 = arith.constant dense<0.000000e+00> : vector<128xf32>
    %28 = vector.multi_reduction <add>, %27, %cst_23 [0] : vector<16x128xf32> to vector<128xf32>
    %29 = vector.shape_cast %28 : vector<128xf32> to vector<1x128xf32>
    %30 = tpu.concatenate %17, %23, %29 in 0 : vector<1x128xf32>, vector<1x128xf32>, vector<1x128xf32> -> vector<3x128xf32>
    %31 = vector.broadcast %8 : vector<1x128xf32> to vector<3x128xf32>
    %32 = arith.subf %30, %31 : vector<3x128xf32>
    %33 = vector.broadcast %11 : f32 to vector<3x128xf32>
    %34 = arith.addf %33, %32 : vector<3x128xf32>
    %c0_24 = arith.constant 0 : index
    %c0_25 = arith.constant 0 : index
    %35 = vector.load %arg7[%c0_24, %c0_25] : memref<3x128xf32, #tpu.memory_space<vmem>>, vector<3x128xf32>
    tpu.vector_store %arg7[%c0_24, %c0_25], %34 {strides = array<i32>} : memref<3x128xf32, #tpu.memory_space<vmem>>, vector<3x128xf32>,
    return
  }
  func.func @transform_0(%arg0: i32) -> i32 {
    %c0_i32 = arith.constant 0 : i32
    %c0_i32_0 = arith.constant 0 : i32
    return %c0_i32 : i32
  }
  func.func @transform_1(%arg0: i32) -> (i32, i32) {
    %c0_i32 = arith.constant 0 : i32
    %c0_i32_0 = arith.constant 0 : i32
    return %c0_i32, %arg0 : i32, i32
  }
  func.func @transform_2(%arg0: i32) -> (i32, i32) {
    %c0_i32 = arith.constant 0 : i32
    %c0_i32_0 = arith.constant 0 : i32
    %c0_i32_1 = arith.constant 0 : i32
    return %c0_i32, %c0_i32_0 : i32, i32
  }
  func.func @transform_3(%arg0: i32) -> (i32, i32, i32) {
    %c0_i32 = arith.constant 0 : i32
    %c0_i32_0 = arith.constant 0 : i32
    %c0_i32_1 = arith.constant 0 : i32
    %c0_i32_2 = arith.constant 0 : i32
    return %c0_i32, %c0_i32_0, %c0_i32_1 : i32, i32, i32
  }
  func.func @transform_4(%arg0: i32) -> (i32, i32) {
    %c0_i32 = arith.constant 0 : i32
    %c0_i32_0 = arith.constant 0 : i32
    %c0_i32_1 = arith.constant 0 : i32
    return %c0_i32, %c0_i32_0 : i32, i32
  }
  func.func @transform_5(%arg0: i32) -> (i32, i32) {
    %c0_i32 = arith.constant 0 : i32
    %c0_i32_0 = arith.constant 0 : i32
    return %c0_i32, %arg0 : i32, i32
  }
  func.func @transform_6(%arg0: i32) -> (i32, i32) {
    %c0_i32 = arith.constant 0 : i32
    %c0_i32_0 = arith.constant 0 : i32
    return %c0_i32, %arg0 : i32, i32
  }
}

</mosaic_0001>

<bundles_post_ra>
// kernel: custom-call.6
= control target key start
LH: loop header
LB: loop body
LE: loop exit
PB: predicated region body
PF: predicated region fallthrough
CT: control target
= control target key end

     0   :  { %v592_v0 = vmov 0.0   ;;  %vm41_vm0 = vcmask 7168   ;;  %vm72_vm1 = vcmask 15368   ;;  %vm89_vm2 = vcmask 1047553   ;;  %s676_s0 = inlined_call_operand.vmem [shape: f32[16,16], index: 0, kind: input, shape index: {}]   ;;  %s677_s1 = inlined_call_operand.vmem [shape: f32[16,16], index: 1, kind: output, shape index: {}]  }
   0x1   :  { %38 = vst [vmem:[#allocation1] sm:$0xff] %v592_v0  ;;  %v606_v4 = vld [vmem:[%s676_s0] sm:$0xff]  ;;  %v612_v5 = vld [vmem:[%s676_s0 + $0x8] sm:$0xff]  ;;  %vm90_vm3 = vmand %vm72_vm1, %vm89_vm2  ;;  %vm107_vm4 = vcmask 23568   ;;  %vm124_vm5 = vcmask 1047554   ;;  %vm142_vm7 = vcmask 31768  }
   0x2   :  { %32 = vst [vmem:[#allocation0] sm:$0xff] %v606_v4  ;;  %34 = vst [vmem:[#allocation0 + $0x8] sm:$0xff] %v612_v5  ;;  %vm159_vm8 = vcmask 1047555   ;;  %vm177_vm10 = vcmask 39968   ;;  %vm194_vm11 = vcmask 1047556   ;;  %vm212_vm13 = vcmask 48168  }
   0x3   :  { %vm125_vm6 = vmand %vm107_vm4, %vm124_vm5  ;;  %vm229_vm14 = vcmask 1047557  }
   0x4   :  { %vm160_vm9 = vmand %vm142_vm7, %vm159_vm8 }
   0x5   :  { %vm195_vm12 = vmand %vm177_vm10, %vm194_vm11 }
   0x6   :  { %vm230_vm15 = vmand %vm212_vm13, %vm229_vm14 }
   0x8   :  { %v42_v1 = vld [vmem:[#allocation1] ss:$0 sm:$0xff] }
   0x9   :  { %v44_v2 = vmul.f32 %v42_v1, %v42_v1  ;;  %v63_v3 = vmul.f32 0.0, %v42_v1  ;;  %v43_v6 = vld [vmem:[#allocation0] ss:$0 sm:$0xff]  ;;  %v76_v22 = vld [vmem:[#allocation0 + $0x1] ss:$0 sm:$0xff] }
   0xa   :  { %v111_v40 = vld [vmem:[#allocation0 + $0x2] ss:$0 sm:$0xff]  ;;  %v146_v58 = vld [vmem:[#allocation0 + $0x3] ss:$0 sm:$0xff] }
   0xb   :  { %45 = vadd.xlane.f32.xlu0 %v44_v2  ;;  %64 = vadd.xlane.f32.xlu1 %v63_v3 }
   0xf   :  { %52 = vadd.xlane.f32.xlu0 %v63_v3 }
  0x98   :  { %v46_v7 = vpop.xlane.xlu0 %45  ;;  %v65_v13 = vpop.xlane.xlu1 %64 }
  0x99   :  { %v47_v8 = vsub.f32 %v43_v6, %v46_v7  ;;  %v66_v15 = vsub.f32 %v612_v5, %v65_v13 }
  0x9b   :  { %560 = vrsqrt.f32 %v47_v8 }
  0x9c   :  { %v53_v9 = vpop.xlane.xlu0 %52 }
  0x9d   :  { %v54_v10 = vsub.f32 %v606_v4, %v53_v9 }
  0xa5   :  { %v561_v11 = vpop.eup %560 }
  0xa6   :  { %v55_v12 = vmul.f32 %v561_v11, %v54_v10  ;;  %v67_v16 = vmul.f32 %v561_v11, %v66_v15 }
  0xa8   :  { %v56_v14 = vsel %vm41_vm0, %v55_v12, 0.0  ;;  %v68_v17 = vsel %vm41_vm0, %v67_v16, 0.0  ;;  %vm247_vm0 = vcmask 56368  }
  0xa9   :  { %58 = vst [vmem:[#allocation1] sm:$0xff] %v56_v14 }
  0xb0   :  { %v74_v18 = vld [vmem:[#allocation1 + $0x1] ss:$0 sm:$0xff] }
  0xb1   :  { %v84_v19 = vmul.f32 %v74_v18, %v56_v14  ;;  %v77_v20 = vmul.f32 %v74_v18, %v74_v18  ;;  %v98_v21 = vmul.f32 %v74_v18, %v68_v17 }
  0xb3   :  { %85 = vadd.xlane.f32.xlu0 %v84_v19  ;;  %78 = vadd.xlane.f32.xlu1 %v77_v20 }
  0xb7   :  { %99 = vadd.xlane.f32.xlu1 %v98_v21 }
 0x140   :  { %v79_v23 = vpop.xlane.xlu1 %78  ;;  %v86_v25 = vpop.xlane.xlu0 %85 }
 0x141   :  { %v80_v24 = vsub.f32 %v76_v22, %v79_v23  ;;  %v87_v26 = vsub.f32 %v606_v4, %v86_v25 }
 0x143   :  { %562 = vrsqrt.f32 %v80_v24 }
 0x144   :  { %v100_v31 = vpop.xlane.xlu1 %99 }
 0x145   :  { %v101_v32 = vsub.f32 %v612_v5, %v100_v31 }
 0x14d   :  { %v563_v27 = vpop.eup %562 }
 0x14e   :  { %v88_v28 = vmul.f32 %v563_v27, %v87_v26  ;;  %v102_v33 = vmul.f32 %v563_v27, %v101_v32  ;;  %v216_v32 = vld [vmem:[#allocation0 + $0x5] ss:$0 sm:$0xff] }
 0x150   :  { %v91_v29 = vsel %vm90_vm3, %v88_v28, 0.0  ;;  %v103_v34 = vsel %vm72_vm1, %v102_v33, 0.0  ;;  %vm264_vm1 = vcmask 1047558  }
 0x151   :  { %v92_v30 = vadd.f32 %v91_v29, %v56_v14  ;;  %v104_v38 = vadd.f32 %v103_v34, %v68_v17  ;;  %v181_v14 = vld [vmem:[#allocation0 + $0x4] ss:$0 sm:$0xff]  ;;  %vm265_vm3 = vmand %vm247_vm0, %vm264_vm1 }
 0x153   :  { %93 = vst [vmem:[#allocation1] sm:$0xff] %v92_v30 }
 0x15a   :  { %v109_v35 = vld [vmem:[#allocation1 + $0x2] ss:$0 sm:$0xff] }
 0x15b   :  { %v119_v36 = vmul.f32 %v109_v35, %v92_v30  ;;  %v112_v37 = vmul.f32 %v109_v35, %v109_v35  ;;  %v133_v39 = vmul.f32 %v109_v35, %v104_v38 }
 0x15d   :  { %120 = vadd.xlane.f32.xlu1 %v119_v36  ;;  %113 = vadd.xlane.f32.xlu0 %v112_v37 }
 0x161   :  { %134 = vadd.xlane.f32.xlu0 %v133_v39 }
 0x1ea   :  { %v114_v41 = vpop.xlane.xlu0 %113  ;;  %v121_v43 = vpop.xlane.xlu1 %120 }
 0x1eb   :  { %v115_v42 = vsub.f32 %v111_v40, %v114_v41  ;;  %v122_v44 = vsub.f32 %v606_v4, %v121_v43 }
 0x1ed   :  { %564 = vrsqrt.f32 %v115_v42 }
 0x1ee   :  { %v135_v49 = vpop.xlane.xlu0 %134 }
 0x1ef   :  { %v136_v50 = vsub.f32 %v612_v5, %v135_v49 }
 0x1f7   :  { %v565_v45 = vpop.eup %564 }
 0x1f8   :  { %v123_v46 = vmul.f32 %v565_v45, %v122_v44  ;;  %v137_v51 = vmul.f32 %v565_v45, %v136_v50  ;;  %v251_v50 = vld [vmem:[#allocation0 + $0x6] ss:$0 sm:$0xff] }
 0x1fa   :  { %v126_v47 = vsel %vm125_vm6, %v123_v46, 0.0  ;;  %v138_v52 = vsel %vm107_vm4, %v137_v51, 0.0  ;;  %vm282_vm4 = vcmask 64568   ;;  %vm317_vm6 = vcmask 72768  }
 0x1fb   :  { %v127_v48 = vadd.f32 %v126_v47, %v92_v30  ;;  %v139_v56 = vadd.f32 %v138_v52, %v104_v38 }
 0x1fd   :  { %128 = vst [vmem:[#allocation1] sm:$0xff] %v127_v48 }
 0x204   :  { %v144_v53 = vld [vmem:[#allocation1 + $0x3] ss:$0 sm:$0xff] }
 0x205   :  { %v154_v54 = vmul.f32 %v144_v53, %v127_v48  ;;  %v147_v55 = vmul.f32 %v144_v53, %v144_v53  ;;  %v168_v57 = vmul.f32 %v144_v53, %v139_v56 }
 0x207   :  { %155 = vadd.xlane.f32.xlu0 %v154_v54  ;;  %148 = vadd.xlane.f32.xlu1 %v147_v55 }
 0x20b   :  { %169 = vadd.xlane.f32.xlu1 %v168_v57 }
 0x294   :  { %v149_v59 = vpop.xlane.xlu1 %148  ;;  %v156_v61 = vpop.xlane.xlu0 %155 }
 0x295   :  { %v150_v60 = vsub.f32 %v146_v58, %v149_v59  ;;  %v157_v62 = vsub.f32 %v606_v4, %v156_v61 }
 0x297   :  { %566 = vrsqrt.f32 %v150_v60 }
 0x298   :  { %v170_v3 = vpop.xlane.xlu1 %169 }
 0x299   :  { %v171_v6 = vsub.f32 %v612_v5, %v170_v3  ;;  %v286_v3 = vld [vmem:[#allocation0 + $0x7] ss:$0 sm:$0xff] }
 0x2a1   :  { %v567_v63 = vpop.eup %566 }
 0x2a2   :  { %v158_v0 = vmul.f32 %v567_v63, %v157_v62  ;;  %v172_v7 = vmul.f32 %v567_v63, %v171_v6 }
 0x2a4   :  { %v161_v1 = vsel %vm160_vm9, %v158_v0, 0.0  ;;  %v173_v8 = vsel %vm142_vm7, %v172_v7, 0.0  ;;  %vm340_vm7 = vcmask 80968  }
 0x2a5   :  { %v162_v2 = vadd.f32 %v161_v1, %v127_v48  ;;  %v174_v12 = vadd.f32 %v173_v8, %v139_v56  ;;  %vm360_vm9 = vmand %vm340_vm7, %vm89_vm2 }
 0x2a7   :  { %163 = vst [vmem:[#allocation1] sm:$0xff] %v162_v2 }
 0x2ae   :  { %v179_v9 = vld [vmem:[#allocation1 + $0x4] ss:$0 sm:$0xff] }
 0x2af   :  { %v189_v10 = vmul.f32 %v179_v9, %v162_v2  ;;  %v182_v11 = vmul.f32 %v179_v9, %v179_v9  ;;  %v203_v13 = vmul.f32 %v179_v9, %v174_v12 }
 0x2b1   :  { %190 = vadd.xlane.f32.xlu1 %v189_v10  ;;  %183 = vadd.xlane.f32.xlu0 %v182_v11 }
 0x2b5   :  { %204 = vadd.xlane.f32.xlu0 %v203_v13 }
 0x33e   :  { %v184_v15 = vpop.xlane.xlu0 %183  ;;  %v191_v17 = vpop.xlane.xlu1 %190 }
 0x33f   :  { %v185_v16 = vsub.f32 %v181_v14, %v184_v15  ;;  %v192_v18 = vsub.f32 %v606_v4, %v191_v17  ;;  %v321_v17 = vld [vmem:[#allocation0 + $0x8] ss:$0 sm:$0xff] }
 0x341   :  { %568 = vrsqrt.f32 %v185_v16 }
 0x342   :  { %v205_v23 = vpop.xlane.xlu0 %204 }
 0x343   :  { %v206_v24 = vsub.f32 %v612_v5, %v205_v23 }
 0x34b   :  { %v569_v19 = vpop.eup %568 }
 0x34c   :  { %v193_v20 = vmul.f32 %v569_v19, %v192_v18  ;;  %v207_v25 = vmul.f32 %v569_v19, %v206_v24 }
 0x34e   :  { %v196_v21 = vsel %vm195_vm12, %v193_v20, 0.0  ;;  %v208_v26 = vsel %vm177_vm10, %v207_v25, 0.0  ;;  %vm365_vm10 = vcmask 89168   ;;  %vm390_vm12 = vcmask 97368  }
 0x34f   :  { %v197_v22 = vadd.f32 %v196_v21, %v162_v2  ;;  %v209_v30 = vadd.f32 %v208_v26, %v174_v12  ;;  %vm385_vm2 = vmand %vm365_vm10, %vm124_vm5 }
 0x350   :  { %vm410_vm5 = vmand %vm390_vm12, %vm159_vm8 }
 0x351   :  { %198 = vst [vmem:[#allocation1] sm:$0xff] %v197_v22 }
 0x358   :  { %v214_v27 = vld [vmem:[#allocation1 + $0x5] ss:$0 sm:$0xff] }
 0x359   :  { %v224_v28 = vmul.f32 %v214_v27, %v197_v22  ;;  %v217_v29 = vmul.f32 %v214_v27, %v214_v27  ;;  %v238_v31 = vmul.f32 %v214_v27, %v209_v30 }
 0x35b   :  { %225 = vadd.xlane.f32.xlu0 %v224_v28  ;;  %218 = vadd.xlane.f32.xlu1 %v217_v29  ;;  %v344_v29 = vld [vmem:[#allocation0 + $0x9] ss:$0 sm:$0xff] }
 0x35f   :  { %239 = vadd.xlane.f32.xlu1 %v238_v31 }
 0x3e8   :  { %v219_v33 = vpop.xlane.xlu1 %218  ;;  %v226_v35 = vpop.xlane.xlu0 %225 }
 0x3e9   :  { %v220_v34 = vsub.f32 %v216_v32, %v219_v33  ;;  %v227_v36 = vsub.f32 %v606_v4, %v226_v35 }
 0x3eb   :  { %570 = vrsqrt.f32 %v220_v34 }
 0x3ec   :  { %v240_v41 = vpop.xlane.xlu1 %239 }
 0x3ed   :  { %v241_v42 = vsub.f32 %v612_v5, %v240_v41  ;;  %v369_v41 = vld [vmem:[#allocation0 + $0xa] ss:$0 sm:$0xff] }
 0x3f5   :  { %v571_v37 = vpop.eup %570 }
 0x3f6   :  { %v228_v38 = vmul.f32 %v571_v37, %v227_v36  ;;  %v242_v43 = vmul.f32 %v571_v37, %v241_v42 }
 0x3f8   :  { %v231_v39 = vsel %vm230_vm15, %v228_v38, 0.0  ;;  %v243_v44 = vsel %vm212_vm13, %v242_v43, 0.0  ;;  %vm415_vm13 = vcmask 105568   ;;  %vm440_vm15 = vcmask 113768  }
 0x3f9   :  { %v232_v40 = vadd.f32 %v231_v39, %v197_v22  ;;  %v244_v48 = vadd.f32 %v243_v44, %v209_v30  ;;  %vm435_vm8 = vmand %vm415_vm13, %vm194_vm11 }
 0x3fa   :  { %vm460_vm11 = vmand %vm440_vm15, %vm229_vm14 }
 0x3fb   :  { %233 = vst [vmem:[#allocation1] sm:$0xff] %v232_v40 }
 0x402   :  { %v249_v45 = vld [vmem:[#allocation1 + $0x6] ss:$0 sm:$0xff] }
 0x403   :  { %v259_v46 = vmul.f32 %v249_v45, %v232_v40  ;;  %v252_v47 = vmul.f32 %v249_v45, %v249_v45  ;;  %v273_v49 = vmul.f32 %v249_v45, %v244_v48 }
 0x405   :  { %260 = vadd.xlane.f32.xlu1 %v259_v46  ;;  %253 = vadd.xlane.f32.xlu0 %v252_v47 }
 0x409   :  { %274 = vadd.xlane.f32.xlu0 %v273_v49 }
 0x492   :  { %v254_v51 = vpop.xlane.xlu0 %253  ;;  %v261_v53 = vpop.xlane.xlu1 %260 }
 0x493   :  { %v255_v52 = vsub.f32 %v251_v50, %v254_v51  ;;  %v262_v54 = vsub.f32 %v606_v4, %v261_v53  ;;  %v394_v53 = vld [vmem:[#allocation0 + $0xb] ss:$0 sm:$0xff] }
 0x495   :  { %572 = vrsqrt.f32 %v255_v52 }
 0x496   :  { %v275_v56 = vpop.xlane.xlu0 %274 }
 0x497   :  { %v276_v59 = vsub.f32 %v612_v5, %v275_v56 }
 0x49f   :  { %v573_v55 = vpop.eup %572 }
 0x4a0   :  { %v263_v57 = vmul.f32 %v573_v55, %v262_v54  ;;  %v277_v61 = vmul.f32 %v573_v55, %v276_v59 }
 0x4a2   :  { %v266_v58 = vsel %vm265_vm3, %v263_v57, 0.0  ;;  %v278_v62 = vsel %vm247_vm0, %v277_v61, 0.0  ;;  %vm299_vm0 = vcmask 1047559   ;;  %vm465_vm3 = vcmask 121968  }
 0x4a3   :  { %v635_v60 = vadd.f32 %v266_v58, %v232_v40  ;;  %v279_v63 = vadd.f32 %v278_v62, %v244_v48  ;;  %vm300_vm14 = vmand %vm282_vm4, %vm299_vm0 }
 0x4a5   :  { %268 = vst [vmem:[#allocation1] sm:$0xff] %v635_v60 }
 0x4ac   :  { %v638_v0 = vld [vmem:[#allocation1 + $0x7] ss:$0 sm:$0xff] }
 0x4ad   :  { %v308_v1 = vmul.f32 %v638_v0, %v279_v63  ;;  %v287_v2 = vmul.f32 %v638_v0, %v638_v0 }
 0x4af   :  { %309 = vadd.xlane.f32.xlu0 %v308_v1  ;;  %288 = vadd.xlane.f32.xlu1 %v287_v2 }
 0x53c   :  { %v289_v6 = vpop.xlane.xlu1 %288  ;;  %v310_v8 = vpop.xlane.xlu0 %309 }
 0x53d   :  { %v290_v7 = vsub.f32 %v286_v3, %v289_v6  ;;  %v311_v9 = vsub.f32 %v612_v5, %v310_v8  ;;  %v419_v3 = vld [vmem:[#allocation0 + $0xc] ss:$0 sm:$0xff] }
 0x53f   :  { %574 = vrsqrt.f32 %v290_v7 }
 0x549   :  { %v644_v10 = vpop.eup %574 }
 0x54a   :  { %v312_v11 = vmul.f32 %v644_v10, %v311_v9 }
 0x54c   :  { %v313_v12 = vsel %vm282_vm4, %v312_v11, 0.0  ;;  %vm490_vm4 = vcmask 130168  }
 0x54d   :  { %v314_v13 = vadd.f32 %v313_v12, %v279_v63 }
 0x54f   :  { %316 = vst [vmem:[#allocation1 + $0x8] sm:$0xff] %v314_v13 }
 0x556   :  { %v319_v14 = vld [vmem:[#allocation1 + $0x8] ss:$0 sm:$0xff] }
 0x557   :  { %v331_v15 = vmul.f32 %v319_v14, %v314_v13  ;;  %v322_v16 = vmul.f32 %v319_v14, %v319_v14 }
 0x559   :  { %332 = vadd.xlane.f32.xlu0 %v331_v15  ;;  %323 = vadd.xlane.f32.xlu1 %v322_v16 }
 0x5e6   :  { %v324_v18 = vpop.xlane.xlu1 %323  ;;  %v333_v20 = vpop.xlane.xlu0 %332 }
 0x5e7   :  { %v325_v19 = vsub.f32 %v321_v17, %v324_v18  ;;  %v334_v21 = vsub.f32 %v612_v5, %v333_v20  ;;  %v444_v18 = vld [vmem:[#allocation0 + $0xd] ss:$0 sm:$0xff] }
 0x5e9   :  { %576 = vrsqrt.f32 %v325_v19 }
 0x5f3   :  { %v577_v22 = vpop.eup %576 }
 0x5f4   :  { %v335_v23 = vmul.f32 %v577_v22, %v334_v21 }
 0x5f6   :  { %v336_v24 = vsel %vm317_vm6, %v335_v23, 0.0  ;;  %vm485_vm6 = vmand %vm465_vm3, %vm264_vm1 }
 0x5f7   :  { %v337_v25 = vadd.f32 %v336_v24, %v314_v13  ;;  %vm510_vm1 = vmand %vm490_vm4, %vm299_vm0 }
 0x5f9   :  { %339 = vst [vmem:[#allocation1 + $0x8] sm:$0xff] %v337_v25 }
 0x600   :  { %v342_v26 = vld [vmem:[#allocation1 + $0x9] ss:$0 sm:$0xff] }
 0x601   :  { %v354_v27 = vmul.f32 %v342_v26, %v337_v25  ;;  %v345_v28 = vmul.f32 %v342_v26, %v342_v26 }
 0x603   :  { %355 = vadd.xlane.f32.xlu0 %v354_v27  ;;  %346 = vadd.xlane.f32.xlu1 %v345_v28 }
 0x690   :  { %v347_v30 = vpop.xlane.xlu1 %346  ;;  %v356_v32 = vpop.xlane.xlu0 %355 }
 0x691   :  { %v348_v31 = vsub.f32 %v344_v29, %v347_v30  ;;  %v357_v33 = vsub.f32 %v612_v5, %v356_v32  ;;  %v294_v30 = vmul.f32 %v638_v0, %v635_v60 }
 0x693   :  { %578 = vrsqrt.f32 %v348_v31  ;;  %v469_v31 = vld [vmem:[#allocation0 + $0xe] ss:$0 sm:$0xff] }
 0x69d   :  { %v579_v34 = vpop.eup %578 }
 0x69e   :  { %v358_v35 = vmul.f32 %v579_v34, %v357_v33 }
 0x6a0   :  { %v361_v36 = vsel %vm360_vm9, %v358_v35, 0.0 }
 0x6a1   :  { %v362_v37 = vadd.f32 %v361_v36, %v337_v25 }
 0x6a3   :  { %364 = vst [vmem:[#allocation1 + $0x8] sm:$0xff] %v362_v37 }
 0x6aa   :  { %v367_v38 = vld [vmem:[#allocation1 + $0xa] ss:$0 sm:$0xff] }
 0x6ab   :  { %v379_v39 = vmul.f32 %v367_v38, %v362_v37  ;;  %v370_v40 = vmul.f32 %v367_v38, %v367_v38 }
 0x6ad   :  { %380 = vadd.xlane.f32.xlu0 %v379_v39  ;;  %371 = vadd.xlane.f32.xlu1 %v370_v40 }
 0x73a   :  { %v372_v42 = vpop.xlane.xlu1 %371  ;;  %v381_v44 = vpop.xlane.xlu0 %380 }
 0x73b   :  { %v373_v43 = vsub.f32 %v369_v41, %v372_v42  ;;  %v382_v45 = vsub.f32 %v612_v5, %v381_v44 }
 0x73d   :  { %580 = vrsqrt.f32 %v373_v43 }
 0x747   :  { %v581_v46 = vpop.eup %580 }
 0x748   :  { %v383_v47 = vmul.f32 %v581_v46, %v382_v45 }
 0x74a   :  { %v386_v48 = vsel %vm385_vm2, %v383_v47, 0.0 }
 0x74b   :  { %v387_v49 = vadd.f32 %v386_v48, %v362_v37 }
 0x74d   :  { %389 = vst [vmem:[#allocation1 + $0x8] sm:$0xff] %v387_v49 }
 0x754   :  { %v392_v50 = vld [vmem:[#allocation1 + $0xb] ss:$0 sm:$0xff] }
 0x755   :  { %v404_v51 = vmul.f32 %v392_v50, %v387_v49  ;;  %v395_v52 = vmul.f32 %v392_v50, %v392_v50 }
 0x757   :  { %405 = vadd.xlane.f32.xlu0 %v404_v51  ;;  %396 = vadd.xlane.f32.xlu1 %v395_v52 }
 0x7e4   :  { %v397_v54 = vpop.xlane.xlu1 %396  ;;  %v406_v56 = vpop.xlane.xlu0 %405 }
 0x7e5   :  { %v398_v55 = vsub.f32 %v394_v53, %v397_v54  ;;  %v407_v57 = vsub.f32 %v612_v5, %v406_v56 }
 0x7e7   :  { %582 = vrsqrt.f32 %v398_v55 }
 0x7f1   :  { %v583_v58 = vpop.eup %582 }
 0x7f2   :  { %v408_v59 = vmul.f32 %v583_v58, %v407_v57 }
 0x7f4   :  { %v411_v61 = vsel %vm410_vm5, %v408_v59, 0.0 }
 0x7f5   :  { %v412_v62 = vadd.f32 %v411_v61, %v387_v49 }
 0x7f7   :  { %414 = vst [vmem:[#allocation1 + $0x8] sm:$0xff] %v412_v62 }
 0x7fe   :  { %v417_v63 = vld [vmem:[#allocation1 + $0xc] ss:$0 sm:$0xff] }
 0x7ff   :  { %v429_v1 = vmul.f32 %v417_v63, %v412_v62  ;;  %v420_v2 = vmul.f32 %v417_v63, %v417_v63 }
 0x801   :  { %430 = vadd.xlane.f32.xlu0 %v429_v1  ;;  %421 = vadd.xlane.f32.xlu1 %v420_v2 }
 0x88e   :  { %v422_v6 = vpop.xlane.xlu1 %421  ;;  %v431_v8 = vpop.xlane.xlu0 %430 }
 0x88f   :  { %v423_v7 = vsub.f32 %v419_v3, %v422_v6  ;;  %v432_v9 = vsub.f32 %v612_v5, %v431_v8 }
 0x891   :  { %584 = vrsqrt.f32 %v423_v7 }
 0x89b   :  { %v585_v11 = vpop.eup %584 }
 0x89c   :  { %v433_v12 = vmul.f32 %v585_v11, %v432_v9 }
 0x89e   :  { %v436_v13 = vsel %vm435_vm8, %v433_v12, 0.0 }
 0x89f   :  { %v437_v14 = vadd.f32 %v436_v13, %v412_v62 }
 0x8a1   :  { %439 = vst [vmem:[#allocation1 + $0x8] sm:$0xff] %v437_v14 }
 0x8a8   :  { %v442_v15 = vld [vmem:[#allocation1 + $0xd] ss:$0 sm:$0xff] }
 0x8a9   :  { %v454_v16 = vmul.f32 %v442_v15, %v437_v14  ;;  %v445_v17 = vmul.f32 %v442_v15, %v442_v15 }
 0x8ab   :  { %455 = vadd.xlane.f32.xlu0 %v454_v16  ;;  %446 = vadd.xlane.f32.xlu1 %v445_v17 }
 0x938   :  { %v447_v19 = vpop.xlane.xlu1 %446  ;;  %v456_v21 = vpop.xlane.xlu0 %455 }
 0x939   :  { %v448_v20 = vsub.f32 %v444_v18, %v447_v19  ;;  %v457_v22 = vsub.f32 %v612_v5, %v456_v21 }
 0x93b   :  { %586 = vrsqrt.f32 %v448_v20 }
 0x945   :  { %v587_v23 = vpop.eup %586 }
 0x946   :  { %v458_v24 = vmul.f32 %v587_v23, %v457_v22 }
 0x948   :  { %v461_v25 = vsel %vm460_vm11, %v458_v24, 0.0 }
 0x949   :  { %v462_v26 = vadd.f32 %v461_v25, %v437_v14 }
 0x94b   :  { %464 = vst [vmem:[#allocation1 + $0x8] sm:$0xff] %v462_v26 }
 0x952   :  { %v467_v27 = vld [vmem:[#allocation1 + $0xe] ss:$0 sm:$0xff] }
 0x953   :  { %v479_v28 = vmul.f32 %v467_v27, %v462_v26  ;;  %v470_v29 = vmul.f32 %v467_v27, %v467_v27 }
 0x955   :  { %480 = vadd.xlane.f32.xlu0 %v479_v28  ;;  %471 = vadd.xlane.f32.xlu1 %v470_v29 }
 0x959   :  { %295 = vadd.xlane.f32.xlu0 %v294_v30 }
 0x9e2   :  { %v481_v32 = vpop.xlane.xlu0 %480  ;;  %v472_v33 = vpop.xlane.xlu1 %471 }
 0x9e3   :  { %v473_v34 = vsub.f32 %v469_v31, %v472_v33  ;;  %v482_v0 = vsub.f32 %v612_v5, %v481_v32 }
 0x9e5   :  { %588 = vrsqrt.f32 %v473_v34 }
 0x9e6   :  { %v296_v35 = vpop.xlane.xlu0 %295 }
 0x9e7   :  { %v297_v36 = vsub.f32 %v606_v4, %v296_v35 }
 0x9e9   :  { %v298_v37 = vmul.f32 %v644_v10, %v297_v36 }
 0x9eb   :  { %v301_v38 = vsel %vm300_vm14, %v298_v37, 0.0 }
 0x9ec   :  { %v302_v39 = vadd.f32 %v301_v38, %v635_v60  ;;  %v494_v60 = vld [vmem:[#allocation0 + $0xf] ss:$0 sm:$0xff] }
 0x9ee   :  { %303 = vst [vmem:[#allocation1] sm:$0xff] %v302_v39  ;;  %545 = vst [vmem:[%s677_s1] sm:$0xff] %v302_v39 }
 0x9ef   :  { %v589_v40 = vpop.eup %588 }
 0x9f0   :  { %v483_v4 = vmul.f32 %v589_v40, %v482_v0 }
 0x9f2   :  { %v486_v41 = vsel %vm485_vm6, %v483_v4, 0.0 }
 0x9f3   :  { %v487_v42 = vadd.f32 %v486_v41, %v462_v26 }
 0x9f5   :  { %489 = vst [vmem:[#allocation1 + $0x8] sm:$0xff] %v487_v42 }
 0x9fc   :  { %v492_v43 = vld [vmem:[#allocation1 + $0xf] ss:$0 sm:$0xff] }
 0x9fd   :  { %v495_v10 = vmul.f32 %v492_v43, %v492_v43  ;;  %v504_v44 = vmul.f32 %v492_v43, %v487_v42 }
 0x9ff   :  { %496 = vadd.xlane.f32.xlu1 %v495_v10 }
 0xa03   :  { %505 = vadd.xlane.f32.xlu1 %v504_v44 }
 0xa8c   :  { %v497_v45 = vpop.xlane.xlu1 %496 }
 0xa8d   :  { %v498_v46 = vsub.f32 %v494_v60, %v497_v45 }
 0xa8f   :  { %590 = vrsqrt.f32 %v498_v46 }
 0xa90   :  { %v506_v47 = vpop.xlane.xlu1 %505 }
 0xa91   :  { %v507_v48 = vsub.f32 %v612_v5, %v506_v47 }
 0xa99   :  { %v591_v49 = vpop.eup %590 }
 0xa9a   :  { %v508_v50 = vmul.f32 %v591_v49, %v507_v48 }
 0xa9c   :  { %v511_v51 = vsel %vm510_vm1, %v508_v50, 0.0 }
 0xa9d   :  { %v512_v52 = vadd.f32 %v511_v51, %v487_v42 }
 0xa9f   :  { %514 = vst [vmem:[#allocation1 + $0x8] sm:$0xff] %v512_v52  ;;  %547 = vst [vmem:[%s677_s1 + $0x8] sm:$0xff] %v512_v52 }

// kernel: custom-call.7
= control target key start
LH: loop header
LB: loop body
LE: loop exit
PB: predicated region body
PF: predicated region fallthrough
CT: control target
= control target key end

     0   :  { %v38_v0 = vlaneseq  ;;  %v332_v9 = vmov -1.0   ;;  %v333_v53 = vmov 0.0   ;;  %s401_s0 = inlined_call_operand.vmem [shape: f32[1,16,16], index: 0, kind: input, shape index: {}]   ;;  %s402_s1 = inlined_call_operand.vmem [shape: f32[1,16,16], index: 1, kind: output, shape index: {}]  }
   0x1   :  { %v31_v1 = vld [vmem:[%s401_s0] sm:$0xff]  ;;  %v33_v36 = vld [vmem:[%s401_s0 + $0x8] sm:$0xff] }
   0x2   :  { %v347_v2 = vand.u32 127, %v38_v0  ;;  %v42_v3 = vshrl.u32 %v38_v0, 7 }
   0x4   :  { %vm44_vm0 = vcmp.eq.s32.totalorder %v42_v3, %v347_v2  ;;  %vm40_vm1 = vcmp.lt.s32.totalorder %v347_v2, 16  ;;  %vm49_vm2 = vcmp.ge.s32.totalorder %v42_v3, %v347_v2  ;;  %vm79_vm4 = vcmp.eq.s32.totalorder %v347_v2, 0 }
   0x5   :  { %v46_v4 = vsel %vm44_vm0, %v31_v1, 0.0  ;;  %vm50_vm3 = vmand %vm49_vm2, %vm40_vm1  ;;  %vm76_vm5 = vcmp.eq.s32.totalorder %v347_v2, %v42_v3  ;;  %v80_v10 = vsel %vm79_vm4, 1.0, %v332_v9  ;;  %vm94_vm6 = vcmp.eq.s32.totalorder %v347_v2, 1 }
   0x6   :  { %47 = vadd.xlane.f32.xlu0 %v46_v4  ;;  %v51_v6 = vsel %vm50_vm3, %v31_v1, 0.0  ;;  %v81_v11 = vsel %vm76_vm5, %v80_v10, 0.0  ;;  %vm104_vm7 = vcmp.eq.s32.totalorder %v347_v2, 2  ;;  %vm114_vm8 = vcmp.eq.s32.totalorder %v347_v2, 3 }
   0x7   :  { %vm124_vm9 = vcmp.eq.s32.totalorder %v347_v2, 4  ;;  %v59_v31 = vadd.s32 8, %v42_v3  ;;  %vm134_vm11 = vcmp.eq.s32.totalorder %v347_v2, 5  ;;  %vm144_vm14 = vcmp.eq.s32.totalorder %v347_v2, 6 }
   0x8   :  { %vm154_vm0 = vcmp.eq.s32.totalorder %v347_v2, 7  ;;  %vm178_vm2 = vcmp.eq.s32.totalorder %v347_v2, 9  ;;  %vm192_vm3 = vcmp.eq.s32.totalorder %v347_v2, 10  ;;  %vm206_vm4 = vcmp.eq.s32.totalorder %v347_v2, 11 }
   0x9   :  { %vm60_vm10 = vcmp.eq.s32.totalorder %v59_v31, %v347_v2  ;;  %vm65_vm12 = vcmp.ge.s32.totalorder %v59_v31, %v347_v2  ;;  %vm87_vm15 = vcmp.eq.s32.totalorder %v347_v2, %v59_v31  ;;  %vm220_vm5 = vcmp.eq.s32.totalorder %v347_v2, 12 }
   0xa   :  { %v62_v37 = vsel %vm60_vm10, %v33_v36, 0.0  ;;  %vm66_vm13 = vmand %vm65_vm12, %vm40_vm1  ;;  %v88_v54 = vsel %vm87_vm15, -1.0, %v333_v53  ;;  %vm164_vm1 = vcmp.eq.s32.totalorder %v347_v2, 8 }
   0xb   :  { %v67_v44 = vsel %vm66_vm13, %v33_v36, 0.0 }
  0x93   :  { %v350_v5 = vpop.xlane.xlu0 %47 }
  0x94   :  { %328 = vrcp.f32 %v350_v5  ;;  %vm273_vm10 = vweird.f32 %v350_v5 }
  0x9e   :  { %v357_v7 = vpop.eup %328 }
  0x9f   :  { %v53_v8 = vmul.f32 %v357_v7, %v51_v6 }
  0xa1   :  { %54 = vst [vmem:[#allocation2] sm:$0xff] %v53_v8 }
  0xa8   :  { %v90_v12 = vld [vmem:[#allocation2 + $0x1] ss:$0 sm:$0xff]  ;;  %v100_v15 = vld [vmem:[#allocation2 + $0x2] ss:$0 sm:$0xff]  ;;  %v110_v20 = vld [vmem:[#allocation2 + $0x3] ss:$0 sm:$0xff] }
  0xa9   :  { %v91_v13 = vxor.u32 2147483648, %v90_v12  ;;  %v101_v17 = vxor.u32 2147483648, %v100_v15  ;;  %v111_v22 = vxor.u32 2147483648, %v110_v20  ;;  %v120_v25 = vld [vmem:[#allocation2 + $0x4] ss:$0 sm:$0xff] }
  0xaa   :  { %v121_v27 = vxor.u32 2147483648, %v120_v25  ;;  %v130_v30 = vld [vmem:[#allocation2 + $0x5] ss:$0 sm:$0xff]  ;;  %v140_v38 = vld [vmem:[#allocation2 + $0x6] ss:$0 sm:$0xff] }
  0xab   :  { %v95_v14 = vmul.f32 %v91_v13, %v81_v11  ;;  %v131_v33 = vxor.u32 2147483648, %v130_v30  ;;  %v141_v40 = vxor.u32 2147483648, %v140_v38  ;;  %v150_v47 = vld [vmem:[#allocation2 + $0x7] ss:$0 sm:$0xff] }
  0xac   :  { %v151_v50 = vxor.u32 2147483648, %v150_v47 }
  0xad   :  { %96 = vadd.xlane.f32.xlu0 %v95_v14 }
 0x13a   :  { %v97_v16 = vpop.xlane.xlu0 %96 }
 0x13b   :  { %v98_v18 = vsel %vm94_vm6, %v97_v16, %v81_v11  ;;  %vm234_vm6 = vcmp.eq.s32.totalorder %v347_v2, 13 }
 0x13c   :  { %v105_v19 = vmul.f32 %v101_v17, %v98_v18 }
 0x13e   :  { %106 = vadd.xlane.f32.xlu1 %v105_v19 }
 0x1cb   :  { %v107_v21 = vpop.xlane.xlu1 %106 }
 0x1cc   :  { %v108_v23 = vsel %vm104_vm7, %v107_v21, %v98_v18  ;;  %vm248_vm7 = vcmp.eq.s32.totalorder %v347_v2, 14 }
 0x1cd   :  { %v115_v24 = vmul.f32 %v111_v22, %v108_v23 }
 0x1cf   :  { %116 = vadd.xlane.f32.xlu1 %v115_v24 }
 0x25c   :  { %v117_v26 = vpop.xlane.xlu1 %116 }
 0x25d   :  { %v118_v28 = vsel %vm114_vm8, %v117_v26, %v108_v23  ;;  %vm262_vm8 = vcmp.eq.s32.totalorder %v347_v2, 15 }
 0x25e   :  { %v125_v29 = vmul.f32 %v121_v27, %v118_v28 }
 0x260   :  { %126 = vadd.xlane.f32.xlu0 %v125_v29 }
 0x2ed   :  { %v127_v32 = vpop.xlane.xlu0 %126 }
 0x2ee   :  { %v128_v34 = vsel %vm124_vm9, %v127_v32, %v118_v28 }
 0x2ef   :  { %v135_v35 = vmul.f32 %v131_v33, %v128_v34 }
 0x2f1   :  { %136 = vadd.xlane.f32.xlu1 %v135_v35 }
 0x2f5   :  { %63 = vadd.xlane.f32.xlu1 %v62_v37 }
 0x37e   :  { %v137_v39 = vpop.xlane.xlu1 %136 }
 0x37f   :  { %v138_v41 = vsel %vm134_vm11, %v137_v39, %v128_v34 }
 0x380   :  { %v145_v42 = vmul.f32 %v141_v40, %v138_v41 }
 0x382   :  { %146 = vadd.xlane.f32.xlu0 %v145_v42  ;;  %v371_v43 = vpop.xlane.xlu1 %63 }
 0x383   :  { %330 = vrcp.f32 %v371_v43  ;;  %vm278_vm9 = vweird.f32 %v371_v43 }
 0x38d   :  { %v377_v45 = vpop.eup %330 }
 0x38e   :  { %v69_v46 = vmul.f32 %v377_v45, %v67_v44 }
 0x390   :  { %70 = vst [vmem:[#allocation2 + $0x8] sm:$0xff] %v69_v46 }
 0x397   :  { %v160_v48 = vld [vmem:[#allocation2 + $0x8] ss:$0 sm:$0xff]  ;;  %v174_v59 = vld [vmem:[#allocation2 + $0x9] ss:$0 sm:$0xff]  ;;  %v188_v4 = vld [vmem:[#allocation2 + $0xa] ss:$0 sm:$0xff] }
 0x398   :  { %v161_v51 = vxor.u32 2147483648, %v160_v48  ;;  %v175_v62 = vxor.u32 2147483648, %v174_v59  ;;  %v189_v9 = vxor.u32 2147483648, %v188_v4  ;;  %v202_v14 = vld [vmem:[#allocation2 + $0xb] ss:$0 sm:$0xff] }
 0x399   :  { %v203_v17 = vxor.u32 2147483648, %v202_v14  ;;  %v216_v22 = vld [vmem:[#allocation2 + $0xc] ss:$0 sm:$0xff]  ;;  %v230_v30 = vld [vmem:[#allocation2 + $0xd] ss:$0 sm:$0xff] }
 0x39a   :  { %v169_v56 = vmul.f32 %v161_v51, %v88_v54  ;;  %v217_v25 = vxor.u32 2147483648, %v216_v22  ;;  %v231_v33 = vxor.u32 2147483648, %v230_v30  ;;  %v244_v38 = vld [vmem:[#allocation2 + $0xe] ss:$0 sm:$0xff]  ;;  %v258_v48 = vld [vmem:[#allocation2 + $0xf] ss:$0 sm:$0xff] }
 0x40f   :  { %v147_v49 = vpop.xlane.xlu0 %146 }
 0x410   :  { %v148_v52 = vsel %vm144_vm14, %v147_v49, %v138_v41  ;;  %v245_v41 = vxor.u32 2147483648, %v244_v38 }
 0x411   :  { %v155_v55 = vmul.f32 %v151_v50, %v148_v52 }
 0x413   :  { %156 = vadd.xlane.f32.xlu0 %v155_v55 }
 0x417   :  { %170 = vadd.xlane.f32.xlu0 %v169_v56 }
 0x4a0   :  { %v157_v57 = vpop.xlane.xlu0 %156 }
 0x4a1   :  { %v158_v58 = vsel %vm154_vm0, %v157_v57, %v148_v52 }
 0x4a2   :  { %v165_v60 = vmul.f32 %v161_v51, %v158_v58  ;;  %v259_v51 = vxor.u32 2147483648, %v258_v48 }
 0x4a4   :  { %v171_v61 = vpop.xlane.xlu0 %170  ;;  %166 = vadd.xlane.f32.xlu1 %v165_v60 }
 0x4a5   :  { %v172_v63 = vsel %vm164_vm1, %v171_v61, %v88_v54 }
 0x4a6   :  { %v183_v0 = vmul.f32 %v175_v62, %v172_v63 }
 0x4a8   :  { %184 = vadd.xlane.f32.xlu0 %v183_v0 }
 0x531   :  { %v167_v1 = vpop.xlane.xlu1 %166 }
 0x532   :  { %v168_v3 = vsel %vm164_vm1, %v167_v1, %v158_v58 }
 0x533   :  { %v179_v6 = vmul.f32 %v175_v62, %v168_v3 }
 0x535   :  { %v185_v8 = vpop.xlane.xlu0 %184  ;;  %180 = vadd.xlane.f32.xlu1 %v179_v6 }
 0x536   :  { %v186_v10 = vsel %vm178_vm2, %v185_v8, %v172_v63 }
 0x537   :  { %v197_v11 = vmul.f32 %v189_v9, %v186_v10 }
 0x539   :  { %198 = vadd.xlane.f32.xlu0 %v197_v11 }
 0x5c2   :  { %v181_v12 = vpop.xlane.xlu1 %180 }
 0x5c3   :  { %v182_v13 = vsel %vm178_vm2, %v181_v12, %v168_v3 }
 0x5c4   :  { %v193_v15 = vmul.f32 %v189_v9, %v182_v13 }
 0x5c6   :  { %v199_v16 = vpop.xlane.xlu0 %198  ;;  %194 = vadd.xlane.f32.xlu1 %v193_v15 }
 0x5c7   :  { %v200_v18 = vsel %vm192_vm3, %v199_v16, %v186_v10 }
 0x5c8   :  { %v211_v19 = vmul.f32 %v203_v17, %v200_v18 }
 0x5ca   :  { %212 = vadd.xlane.f32.xlu0 %v211_v19 }
 0x653   :  { %v195_v20 = vpop.xlane.xlu1 %194 }
 0x654   :  { %v196_v21 = vsel %vm192_vm3, %v195_v20, %v182_v13 }
 0x655   :  { %v207_v23 = vmul.f32 %v203_v17, %v196_v21 }
 0x657   :  { %v213_v24 = vpop.xlane.xlu0 %212  ;;  %208 = vadd.xlane.f32.xlu1 %v207_v23 }
 0x658   :  { %v214_v26 = vsel %vm206_vm4, %v213_v24, %v200_v18 }
 0x659   :  { %v225_v27 = vmul.f32 %v217_v25, %v214_v26 }
 0x65b   :  { %226 = vadd.xlane.f32.xlu0 %v225_v27 }
 0x6e4   :  { %v209_v28 = vpop.xlane.xlu1 %208 }
 0x6e5   :  { %v210_v29 = vsel %vm206_vm4, %v209_v28, %v196_v21 }
 0x6e6   :  { %v221_v31 = vmul.f32 %v217_v25, %v210_v29 }
 0x6e8   :  { %v227_v32 = vpop.xlane.xlu0 %226  ;;  %222 = vadd.xlane.f32.xlu1 %v221_v31 }
 0x6e9   :  { %v228_v34 = vsel %vm220_vm5, %v227_v32, %v214_v26 }
 0x6ea   :  { %v239_v35 = vmul.f32 %v231_v33, %v228_v34 }
 0x6ec   :  { %240 = vadd.xlane.f32.xlu0 %v239_v35 }
 0x775   :  { %v223_v36 = vpop.xlane.xlu1 %222 }
 0x776   :  { %v224_v37 = vsel %vm220_vm5, %v223_v36, %v210_v29 }
 0x777   :  { %v235_v39 = vmul.f32 %v231_v33, %v224_v37 }
 0x779   :  { %v241_v40 = vpop.xlane.xlu0 %240  ;;  %236 = vadd.xlane.f32.xlu1 %v235_v39 }
 0x77a   :  { %v242_v42 = vsel %vm234_vm6, %v241_v40, %v228_v34 }
 0x77b   :  { %v253_v44 = vmul.f32 %v245_v41, %v242_v42 }
 0x77d   :  { %254 = vadd.xlane.f32.xlu0 %v253_v44 }
 0x806   :  { %v237_v46 = vpop.xlane.xlu1 %236 }
 0x807   :  { %v238_v47 = vsel %vm234_vm6, %v237_v46, %v224_v37 }
 0x808   :  { %v249_v49 = vmul.f32 %v245_v41, %v238_v47 }
 0x80a   :  { %v255_v50 = vpop.xlane.xlu0 %254  ;;  %250 = vadd.xlane.f32.xlu1 %v249_v49 }
 0x80b   :  { %v256_v52 = vsel %vm248_vm7, %v255_v50, %v242_v42 }
 0x80c   :  { %v267_v53 = vmul.f32 %v259_v51, %v256_v52 }
 0x80e   :  { %268 = vadd.xlane.f32.xlu0 %v267_v53 }
 0x897   :  { %v251_v54 = vpop.xlane.xlu1 %250 }
 0x898   :  { %v252_v55 = vsel %vm248_vm7, %v251_v54, %v238_v47 }
 0x899   :  { %v263_v56 = vmul.f32 %v259_v51, %v252_v55 }
 0x89b   :  { %v269_v57 = vpop.xlane.xlu0 %268  ;;  %264 = vadd.xlane.f32.xlu1 %v263_v56 }
 0x89c   :  { %v270_v58 = vsel %vm262_vm8, %v269_v57, %v256_v52 }
 0x89d   :  { %v277_v59 = vmul.f32 %v377_v45, %v270_v58 }
 0x89f   :  { %v279_v60 = vsel %vm278_vm9, %v270_v58, %v277_v59 }
 0x8a0   :  { %314 = vst [vmem:[%s402_s1 + $0x8] sm:$0xff] %v279_v60 }
 0x928   :  { %v265_v61 = vpop.xlane.xlu1 %264 }
 0x929   :  { %v266_v62 = vsel %vm262_vm8, %v265_v61, %v252_v55 }
 0x92a   :  { %v272_v63 = vmul.f32 %v357_v7, %v266_v62 }
 0x92c   :  { %v274_v2 = vsel %vm273_vm10, %v266_v62, %v272_v63 }
 0x92d   :  { %312 = vst [vmem:[%s402_s1] sm:$0xff] %v274_v2 }

// kernel: custom-call.8
= control target key start
LH: loop header
LB: loop body
LE: loop exit
PB: predicated region body
PF: predicated region fallthrough
CT: control target
= control target key end

     0   :  { %v38_v0 = vlaneseq  ;;  %v331_v10 = vmov -1.0   ;;  %v332_v47 = vmov 0.0   ;;  %s434_s0 = inlined_call_operand.vmem [shape: f32[1,16,16], index: 0, kind: input, shape index: {}]   ;;  %s435_s1 = inlined_call_operand.vmem [shape: f32[1,16,16], index: 1, kind: output, shape index: {}]  }
   0x1   :  { %v33_v3 = vld [vmem:[%s434_s0 + $0x8] sm:$0xff]  ;;  %v31_v36 = vld [vmem:[%s434_s0] sm:$0xff] }
   0x2   :  { %v343_v1 = vand.u32 127, %v38_v0  ;;  %v345_v2 = vshrl.u32 %v38_v0, 7 }
   0x4   :  { %vm40_vm0 = vcmp.lt.s32.totalorder %v343_v1, 16  ;;  %v59_v4 = vadd.s32 8, %v345_v2  ;;  %vm86_vm4 = vcmp.eq.s32.totalorder %v343_v1, 15  ;;  %vm94_vm6 = vcmp.eq.s32.totalorder %v343_v1, 14 }
   0x5   :  { %v87_v11 = vsel %vm86_vm4, 1.0, %v331_v10  ;;  %vm104_vm7 = vcmp.eq.s32.totalorder %v343_v1, 13  ;;  %vm114_vm8 = vcmp.eq.s32.totalorder %v343_v1, 12  ;;  %vm124_vm9 = vcmp.eq.s32.totalorder %v343_v1, 11 }
   0x6   :  { %vm60_vm1 = vcmp.eq.s32.totalorder %v59_v4, %v343_v1  ;;  %vm65_vm2 = vcmp.le.s32.totalorder %v59_v4, %v343_v1  ;;  %vm83_vm5 = vcmp.eq.s32.totalorder %v343_v1, %v59_v4  ;;  %vm44_vm10 = vcmp.eq.s32.totalorder %v345_v2, %v343_v1 }
   0x7   :  { %v62_v5 = vsel %vm60_vm1, %v33_v3, 0.0  ;;  %vm66_vm3 = vmand %vm65_vm2, %vm40_vm0  ;;  %v88_v12 = vsel %vm83_vm5, %v87_v11, 0.0  ;;  %v46_v37 = vsel %vm44_vm10, %v31_v36, 0.0  ;;  %vm134_vm11 = vcmp.eq.s32.totalorder %v343_v1, 10 }
   0x8   :  { %v67_v6 = vsel %vm66_vm3, %v33_v3, 0.0  ;;  %63 = vadd.xlane.f32.xlu0 %v62_v5  ;;  %vm49_vm12 = vcmp.le.s32.totalorder %v345_v2, %v343_v1  ;;  %vm76_vm14 = vcmp.eq.s32.totalorder %v343_v1, %v345_v2  ;;  %vm144_vm15 = vcmp.eq.s32.totalorder %v343_v1, 9 }
   0x9   :  { %vm50_vm13 = vmand %vm49_vm12, %vm40_vm0  ;;  %v77_v48 = vsel %vm76_vm14, -1.0, %v332_v47  ;;  %vm164_vm0 = vcmp.eq.s32.totalorder %v343_v1, 7  ;;  %vm154_vm1 = vcmp.eq.s32.totalorder %v343_v1, 8  ;;  %vm178_vm2 = vcmp.eq.s32.totalorder %v343_v1, 6 }
   0xa   :  { %v51_v44 = vsel %vm50_vm13, %v31_v36, 0.0  ;;  %vm192_vm3 = vcmp.eq.s32.totalorder %v343_v1, 5  ;;  %vm206_vm4 = vcmp.eq.s32.totalorder %v343_v1, 4  ;;  %vm220_vm5 = vcmp.eq.s32.totalorder %v343_v1, 3 }
  0x95   :  { %v356_v7 = vpop.xlane.xlu0 %63 }
  0x96   :  { %327 = vrcp.f32 %v356_v7  ;;  %vm277_vm10 = vweird.f32 %v356_v7 }
  0xa0   :  { %v359_v8 = vpop.eup %327 }
  0xa1   :  { %v69_v9 = vmul.f32 %v359_v8, %v67_v6 }
  0xa3   :  { %70 = vst [vmem:[#allocation2 + $0x8] sm:$0xff] %v69_v9 }
  0xaa   :  { %v90_v13 = vld [vmem:[#allocation2 + $0xe] ss:$0 sm:$0xff]  ;;  %v100_v16 = vld [vmem:[#allocation2 + $0xd] ss:$0 sm:$0xff]  ;;  %v110_v21 = vld [vmem:[#allocation2 + $0xc] ss:$0 sm:$0xff] }
  0xab   :  { %v91_v14 = vxor.u32 2147483648, %v90_v13  ;;  %v101_v18 = vxor.u32 2147483648, %v100_v16  ;;  %v111_v23 = vxor.u32 2147483648, %v110_v21  ;;  %v120_v26 = vld [vmem:[#allocation2 + $0xb] ss:$0 sm:$0xff] }
  0xac   :  { %v121_v28 = vxor.u32 2147483648, %v120_v26  ;;  %v130_v31 = vld [vmem:[#allocation2 + $0xa] ss:$0 sm:$0xff]  ;;  %v140_v38 = vld [vmem:[#allocation2 + $0x9] ss:$0 sm:$0xff] }
  0xad   :  { %v95_v15 = vmul.f32 %v91_v14, %v88_v12  ;;  %v131_v33 = vxor.u32 2147483648, %v130_v31  ;;  %v141_v40 = vxor.u32 2147483648, %v140_v38  ;;  %v150_v52 = vld [vmem:[#allocation2 + $0x8] ss:$0 sm:$0xff] }
  0xae   :  { %v151_v54 = vxor.u32 2147483648, %v150_v52 }
  0xaf   :  { %96 = vadd.xlane.f32.xlu0 %v95_v15 }
 0x13c   :  { %v97_v17 = vpop.xlane.xlu0 %96 }
 0x13d   :  { %v98_v19 = vsel %vm94_vm6, %v97_v17, %v88_v12  ;;  %vm234_vm6 = vcmp.eq.s32.totalorder %v343_v1, 2 }
 0x13e   :  { %v105_v20 = vmul.f32 %v101_v18, %v98_v19 }
 0x140   :  { %106 = vadd.xlane.f32.xlu1 %v105_v20 }
 0x1cd   :  { %v107_v22 = vpop.xlane.xlu1 %106 }
 0x1ce   :  { %v108_v24 = vsel %vm104_vm7, %v107_v22, %v98_v19  ;;  %vm248_vm7 = vcmp.eq.s32.totalorder %v343_v1, 1 }
 0x1cf   :  { %v115_v25 = vmul.f32 %v111_v23, %v108_v24 }
 0x1d1   :  { %116 = vadd.xlane.f32.xlu1 %v115_v25 }
 0x25e   :  { %v117_v27 = vpop.xlane.xlu1 %116 }
 0x25f   :  { %v118_v29 = vsel %vm114_vm8, %v117_v27, %v108_v24  ;;  %vm261_vm8 = vcmp.eq.s32.totalorder %v343_v1, 0 }
 0x260   :  { %v125_v30 = vmul.f32 %v121_v28, %v118_v29 }
 0x262   :  { %126 = vadd.xlane.f32.xlu0 %v125_v30 }
 0x2ef   :  { %v127_v32 = vpop.xlane.xlu0 %126 }
 0x2f0   :  { %v128_v34 = vsel %vm124_vm9, %v127_v32, %v118_v29 }
 0x2f1   :  { %v135_v35 = vmul.f32 %v131_v33, %v128_v34 }
 0x2f3   :  { %136 = vadd.xlane.f32.xlu1 %v135_v35 }
 0x2f7   :  { %47 = vadd.xlane.f32.xlu1 %v46_v37 }
 0x380   :  { %v137_v39 = vpop.xlane.xlu1 %136 }
 0x381   :  { %v138_v41 = vsel %vm134_vm11, %v137_v39, %v128_v34 }
 0x382   :  { %v145_v42 = vmul.f32 %v141_v40, %v138_v41 }
 0x384   :  { %146 = vadd.xlane.f32.xlu0 %v145_v42  ;;  %v374_v43 = vpop.xlane.xlu1 %47 }
 0x385   :  { %329 = vrcp.f32 %v374_v43  ;;  %vm272_vm9 = vweird.f32 %v374_v43 }
 0x38f   :  { %v381_v45 = vpop.eup %329 }
 0x390   :  { %v53_v46 = vmul.f32 %v381_v45, %v51_v44 }
 0x392   :  { %54 = vst [vmem:[#allocation2] sm:$0xff] %v53_v46 }
 0x399   :  { %v160_v49 = vld [vmem:[#allocation2 + $0x7] ss:$0 sm:$0xff]  ;;  %v174_v57 = vld [vmem:[#allocation2 + $0x6] ss:$0 sm:$0xff]  ;;  %v188_v2 = vld [vmem:[#allocation2 + $0x5] ss:$0 sm:$0xff] }
 0x39a   :  { %v161_v50 = vxor.u32 2147483648, %v160_v49  ;;  %v175_v58 = vxor.u32 2147483648, %v174_v57  ;;  %v189_v4 = vxor.u32 2147483648, %v188_v2  ;;  %v202_v12 = vld [vmem:[#allocation2 + $0x4] ss:$0 sm:$0xff] }
 0x39b   :  { %v203_v14 = vxor.u32 2147483648, %v202_v12  ;;  %v216_v20 = vld [vmem:[#allocation2 + $0x3] ss:$0 sm:$0xff]  ;;  %v230_v28 = vld [vmem:[#allocation2 + $0x2] ss:$0 sm:$0xff] }
 0x39c   :  { %v165_v51 = vmul.f32 %v161_v50, %v77_v48  ;;  %v217_v22 = vxor.u32 2147483648, %v216_v20  ;;  %v231_v30 = vxor.u32 2147483648, %v230_v28  ;;  %v244_v36 = vld [vmem:[#allocation2 + $0x1] ss:$0 sm:$0xff]  ;;  %v257_v46 = vld [vmem:[#allocation2] ss:$0 sm:$0xff] }
 0x39d   :  { %v245_v38 = vxor.u32 2147483648, %v244_v36 }
 0x39e   :  { %166 = vadd.xlane.f32.xlu1 %v165_v51 }
 0x411   :  { %v147_v53 = vpop.xlane.xlu0 %146 }
 0x412   :  { %v148_v55 = vsel %vm144_vm15, %v147_v53, %v138_v41 }
 0x413   :  { %v155_v56 = vmul.f32 %v151_v54, %v148_v55 }
 0x415   :  { %156 = vadd.xlane.f32.xlu0 %v155_v56 }
 0x42b   :  { %v167_v59 = vpop.xlane.xlu1 %166 }
 0x42c   :  { %v168_v60 = vsel %vm164_vm0, %v167_v59, %v77_v48  ;;  %v258_v48 = vxor.u32 2147483648, %v257_v46 }
 0x42d   :  { %v179_v61 = vmul.f32 %v175_v58, %v168_v60 }
 0x42f   :  { %180 = vadd.xlane.f32.xlu1 %v179_v61 }
 0x4a2   :  { %v157_v62 = vpop.xlane.xlu0 %156 }
 0x4a3   :  { %v158_v63 = vsel %vm154_vm1, %v157_v62, %v148_v55 }
 0x4a4   :  { %v169_v0 = vmul.f32 %v161_v50, %v158_v63 }
 0x4a6   :  { %170 = vadd.xlane.f32.xlu0 %v169_v0 }
 0x4bc   :  { %v181_v3 = vpop.xlane.xlu1 %180 }
 0x4bd   :  { %v182_v5 = vsel %vm178_vm2, %v181_v3, %v168_v60 }
 0x4be   :  { %v193_v6 = vmul.f32 %v189_v4, %v182_v5 }
 0x4c0   :  { %194 = vadd.xlane.f32.xlu1 %v193_v6 }
 0x533   :  { %v171_v9 = vpop.xlane.xlu0 %170 }
 0x534   :  { %v172_v10 = vsel %vm164_vm0, %v171_v9, %v158_v63 }
 0x535   :  { %v183_v11 = vmul.f32 %v175_v58, %v172_v10 }
 0x537   :  { %184 = vadd.xlane.f32.xlu0 %v183_v11 }
 0x54d   :  { %v195_v13 = vpop.xlane.xlu1 %194 }
 0x54e   :  { %v196_v15 = vsel %vm192_vm3, %v195_v13, %v182_v5 }
 0x54f   :  { %v207_v16 = vmul.f32 %v203_v14, %v196_v15 }
 0x551   :  { %208 = vadd.xlane.f32.xlu1 %v207_v16 }
 0x5c4   :  { %v185_v17 = vpop.xlane.xlu0 %184 }
 0x5c5   :  { %v186_v18 = vsel %vm178_vm2, %v185_v17, %v172_v10 }
 0x5c6   :  { %v197_v19 = vmul.f32 %v189_v4, %v186_v18 }
 0x5c8   :  { %198 = vadd.xlane.f32.xlu0 %v197_v19 }
 0x5de   :  { %v209_v21 = vpop.xlane.xlu1 %208 }
 0x5df   :  { %v210_v23 = vsel %vm206_vm4, %v209_v21, %v196_v15 }
 0x5e0   :  { %v221_v24 = vmul.f32 %v217_v22, %v210_v23 }
 0x5e2   :  { %222 = vadd.xlane.f32.xlu1 %v221_v24 }
 0x655   :  { %v199_v25 = vpop.xlane.xlu0 %198 }
 0x656   :  { %v200_v26 = vsel %vm192_vm3, %v199_v25, %v186_v18 }
 0x657   :  { %v211_v27 = vmul.f32 %v203_v14, %v200_v26 }
 0x659   :  { %212 = vadd.xlane.f32.xlu0 %v211_v27 }
 0x66f   :  { %v223_v29 = vpop.xlane.xlu1 %222 }
 0x670   :  { %v224_v31 = vsel %vm220_vm5, %v223_v29, %v210_v23 }
 0x671   :  { %v235_v32 = vmul.f32 %v231_v30, %v224_v31 }
 0x673   :  { %236 = vadd.xlane.f32.xlu1 %v235_v32 }
 0x6e6   :  { %v213_v33 = vpop.xlane.xlu0 %212 }
 0x6e7   :  { %v214_v34 = vsel %vm206_vm4, %v213_v33, %v200_v26 }
 0x6e8   :  { %v225_v35 = vmul.f32 %v217_v22, %v214_v34 }
 0x6ea   :  { %226 = vadd.xlane.f32.xlu0 %v225_v35 }
 0x700   :  { %v237_v37 = vpop.xlane.xlu1 %236 }
 0x701   :  { %v238_v39 = vsel %vm234_vm6, %v237_v37, %v224_v31 }
 0x702   :  { %v249_v40 = vmul.f32 %v245_v38, %v238_v39 }
 0x704   :  { %250 = vadd.xlane.f32.xlu1 %v249_v40 }
 0x777   :  { %v227_v41 = vpop.xlane.xlu0 %226 }
 0x778   :  { %v228_v42 = vsel %vm220_vm5, %v227_v41, %v214_v34 }
 0x779   :  { %v239_v44 = vmul.f32 %v231_v30, %v228_v42 }
 0x77b   :  { %240 = vadd.xlane.f32.xlu0 %v239_v44 }
 0x791   :  { %v251_v47 = vpop.xlane.xlu1 %250 }
 0x792   :  { %v252_v49 = vsel %vm248_vm7, %v251_v47, %v238_v39 }
 0x793   :  { %v262_v50 = vmul.f32 %v258_v48, %v252_v49 }
 0x795   :  { %263 = vadd.xlane.f32.xlu1 %v262_v50 }
 0x808   :  { %v241_v51 = vpop.xlane.xlu0 %240 }
 0x809   :  { %v242_v52 = vsel %vm234_vm6, %v241_v51, %v228_v42 }
 0x80a   :  { %v253_v53 = vmul.f32 %v245_v38, %v242_v52 }
 0x80c   :  { %254 = vadd.xlane.f32.xlu0 %v253_v53 }
 0x822   :  { %v264_v54 = vpop.xlane.xlu1 %263 }
 0x823   :  { %v265_v55 = vsel %vm261_vm8, %v264_v54, %v252_v49 }
 0x824   :  { %v271_v56 = vmul.f32 %v381_v45, %v265_v55 }
 0x826   :  { %v273_v57 = vsel %vm272_vm9, %v265_v55, %v271_v56 }
 0x827   :  { %311 = vst [vmem:[%s435_s1] sm:$0xff] %v273_v57 }
 0x899   :  { %v255_v58 = vpop.xlane.xlu0 %254 }
 0x89a   :  { %v256_v59 = vsel %vm248_vm7, %v255_v58, %v242_v52 }
 0x89b   :  { %v266_v60 = vmul.f32 %v258_v48, %v256_v59 }
 0x89d   :  { %267 = vadd.xlane.f32.xlu0 %v266_v60 }
 0x92a   :  { %v268_v61 = vpop.xlane.xlu0 %267 }
 0x92b   :  { %v269_v62 = vsel %vm261_vm8, %v268_v61, %v256_v59 }
 0x92c   :  { %v276_v63 = vmul.f32 %v359_v8, %v269_v62 }
 0x92e   :  { %v278_v45 = vsel %vm277_vm10, %v269_v62, %v276_v63 }
 0x92f   :  { %313 = vst [vmem:[%s435_s1 + $0x8] sm:$0xff] %v278_v45 }

// kernel: sparse_gp_forward.2
= control target key start
LH: loop header
LB: loop body
LE: loop exit
PB: predicated region body
PF: predicated region fallthrough
CT: control target
= control target key end

     0   :  { %s1327_s0 = inlined_call_operand.<no memory space> [shape: f32[1], index: 0, kind: input, shape index: {}]   ;;  %s1328_s1 = inlined_call_operand.<no memory space> [shape: f32[1], index: 1, kind: input, shape index: {}]   ;;  %s1329_s2 = inlined_call_operand.vmem [shape: f32[16,4], index: 2, kind: input, shape index: {}]   ;;  %s1330_s3 = inlined_call_operand.vmem [shape: f32[256,4], index: 3, kind: input, shape index: {}]   ;;  %s1331_s4 = inlined_call_operand.vmem [shape: f32[16,16], index: 4, kind: output, shape index: {0}]   ;;  %s1332_s5 = inlined_call_operand.vmem [shape: f32[16,256], index: 5, kind: output, shape index: {1}]  }
   0x1   :  { %11 = sst [smem:[#allocation2]] %s1327_s0 }
   0x2   :  { %12 = sst [smem:[#allocation3]] %s1328_s1 }
   0x3   :  { %s1105_s22 = smov 0   ;;  %s1107_s23 = smov 0  }
   0x4   :  { %s1109_s24 = smov 0  }
   0x5 LB: > { %s1116_s0 = sadd.s32 4294967295, %s1067_s24   ;;  %s1118_s1 = sadd.s32 1, %s1067_s24   ;;  %s1067_s24 = sphi %s1109_s24, %s1338_s24   ;;  %s1063_s23 = sphi %s1107_s23, %s1337_s23   ;;  %s1059_s22 = sphi %s1105_s22, %s1336_s22  }
   0x6   : > { %s132_s25 = ssub.s32 %s1067_s24, %s1118_s1  ;;  %s135_s26 = sadd.s32 1, %s1063_s23 }
   0x7   : > { %p133_p0 = scmp.eq.s32.totalorder %s132_s25, 0  ;;  %p145_p1 = scmp.ne.s32.totalorder %s1063_s23, %s1059_s22 }
   0x8   : > { %p146_p2 = scmp.eq.s32.totalorder %s1116_s0, 1  ;;  %p860_p3 = scmp.ge.s32.totalorder %s1067_s24, 1 }
   0x9   : > { %s1125_s27 = scalar_select %p133_p0, %s1063_s23, %s135_s26  }
   0xa   : > { %p1127_p4 = por %p146_p2, %p145_p1  ;;  %p188_p5 = scmp.lt.s32.totalorder %s1067_s24, 3 }
   0xc   : > { %p189_p6 = pnand %p860_p3, %p188_p5 }
   0xd   : > { %s212_s29 = sand.u32 (!%p189_p6), 1, %s1059_s22   ;;  %s862_s30 = sshll.u32 (!%p189_p6), %s1116_s0, 4  ;;  %v228_v3 = vld [vmem:[%s1329_s2] sm:$0xff] (!%p189_p6)  ;;  %v229_v4 = vld [vmem:[%s1329_s2 + $0x8] sm:$0xff] (!%p189_p6)  ;;  %vm235_vm0 = vcmask (!%p189_p6), 31744  }
   0xe   : > { %192 = sbr.rel (%p189_p6) target bundleno = 647 (0x287), region = 36  ;;  %s861_s6 = sshll.u32 (!%p189_p6), %s212_s29, 4 }
   0xf   : > { %p216_p7 = scmp.lt.s32.totalorder (!%p189_p6), %s862_s30, 31  ;;  %s221_s7 = sld [smem:[#allocation2]] (!%p189_p6) }
  0x10   : > { %s1153_s18 = sld [smem:[#allocation3]] (!%p189_p6)  ;;  %s1159_s19 = scalar_lea.vmem (!%p189_p6), [#allocation4], %s861_s6 }
  0x11   : > { %p864_p8 = scmp.ne.s32.totalorder (!%p189_p6), %s1116_s0, 0 }
  0x15   : > { %s1340_s30 = smov (!%p216_p7, %s862_s30), 31  ;;  %s222_s12 = ssub.f32 0.0, %s221_s7  ;;  %vm956_vm1 = vmpackc.low (!%p864_p8), %vm235_vm0, %vm235_vm0  ;;  %v329_v15 = vlaneseq (!%p864_p8)  ;;  %vm340_vm2 = vcmask (!%p864_p8), 130112   ;;  %vm370_vm3 = vcmask (!%p864_p8), 130048  }
  0x16   : > { %s863_s8 = sshll.u32 %s1340_s30, 3  ;;  %v363_v31 = vstv (!%p864_p8), %s1153_s18 }
  0x17   : > { %s1135_s11 = scalar_lea.vmem %s1330_s3, %s863_s8  ;;  %v223_v0 = vstv %s222_s12  ;;  %v330_v16 = vand.u32 (!%p864_p8), 127, %v329_v15  ;;  %v332_v17 = vshrl.u32 (!%p864_p8), %v329_v15, 7 }
  0x18   : > { %v224_v1 = vmul.f32 1.442695, %v223_v0 }
  0x19   : > { %v335_v18 = vadd.s32 (!%p864_p8), 4294967288, %v330_v16  ;;  %v333_v19 = vsub.s32 (!%p864_p8), %v330_v16, %v332_v17 }
  0x1a   : > { %1035 = vpow2.f32 %v224_v1 }
  0x1b   : > { %v338_v20 = vsub.s32 (!%p864_p8), %v335_v18, %v332_v17 }
  0x24   : > { %v1036_v2 = vpop.eup %1035 }
  0x25   : > { %1009 = vpush %v1036_v2 }
  0x56   : > { %s1010_s17 = spop %1009 }
  0x57   : > { %v1143_v5 = vstv %s1010_s17 }
  0x58   : > { %v231_v6 = vmul.f32 %v1143_v5, %v228_v3  ;;  %v1147_v7 = vmul.f32 %v1143_v5, %v229_v4 }
  0x5a   : > { %v233_v8 = vmul.f32 %v231_v6, %v231_v6  ;;  %v234_v9 = vmul.f32 %v1147_v7, %v1147_v7  ;;  %v955_v14 = vpack.c.bf16 (!%p864_p8), %v1147_v7, %v231_v6  ;;  %917 = vmatprep.mubr.msk.f32.mxu0 (!%p864_p8), %vm235_vm0, %v231_v6 }
  0x5c   : > { %v236_v10 = vsel %vm235_vm0, %v233_v8, 0.0  ;;  %v239_v11 = vsel %vm235_vm0, %v234_v9, 0.0  ;;  %957 = vmatprep.subr.msk.bf16.mxu0 (!%p864_p8), %vm956_vm1, %v955_v14 }
  0x5d   : > { %237 = vadd.xlane.f32.xlu0 %v236_v10  ;;  %960 = vmatpush3.bf16.xpose.msk.msra.mxu0 (!%p864_p8), %vm956_vm1, %v955_v14 }
  0x61   : > { %240 = vadd.xlane.f32.xlu0 %v239_v11 }
  0x64   : > { %918 = vmatmul.mubr.msk.f32.vlgmr.msra.gmra.mrb[0].mxu0 (!%p864_p8), %vm235_vm0, %v1147_v7 }
  0xe8   : > { %245 = sbr.rel (%p864_p8) target bundleno = 335 (0x14f), region = 40 }
  0xea   : > { %v1155_v12 = vpop.xlane.xlu0 %237 }
  0xeb   : > { %v334_v21 = vrot.slane (!%p864_p8), %v1155_v12, %v333_v19 }
  0xee   : > { %v1157_v13 = vpop.xlane.xlu0 %240 }
  0xef   : > { %v339_v22 = vrot.slane %v1157_v13, %v338_v20 }
  0xf1   : > { %v341_v23 = vsel %vm340_vm2, %v339_v22, %v334_v21 }
  0xf2   : > { %v356_v24 = vadd.f32 %v341_v23, %v1157_v13  ;;  %v355_v26 = vadd.f32 %v341_v23, %v1155_v12 }
 0x137   : > { %v919_v25 = vpop.f32.mrb[0].mxu0 }
 0x138   : > { %v358_v27 = vmul.f32 2.0, %v919_v25  ;;  %v318_v28 = vpop.f32.mrb[1].mxu0 }
 0x139   : > { %v357_v29 = vmul.f32 2.0, %v318_v28 }
 0x13a   : > { %v360_v30 = vsub.f32 %v356_v24, %v358_v27 }
 0x13b   : > { %v359_v32 = vsub.f32 %v355_v26, %v357_v29 }
 0x13c   : > { %v362_v33 = vmax.f32 %v360_v30, 0.0 }
 0x13d   : > { %v361_v34 = vmax.f32 %v359_v32, 0.0 }
 0x13e   : > { %v365_v35 = vsub.f32 %v363_v31, %v362_v33 }
 0x13f   : > { %v364_v36 = vsub.f32 %v363_v31, %v361_v34 }
 0x140   : > { %v368_v37 = vmul.f32 1.442695, %v365_v35 }
 0x141   : > { %v366_v38 = vmul.f32 1.442695, %v364_v36 }
 0x142   : > { %1037 = vpow2.f32 %v368_v37 }
 0x143   : > { %1039 = vpow2.f32 %v366_v38 }
 0x14c   : > { %v1038_v39 = vpop.eup %1037 }
 0x14d   : > { %v1040_v40 = vpop.eup %1039  ;;  %372 = vst.msk [vmem:[%s1331_s4 + $0x8] sm:$0xff] %vm370_vm3, %v1038_v39 }
 0x14e   : > { %371 = vst.msk [vmem:[%s1331_s4] sm:$0xff] %vm370_vm3, %v1040_v40 }
 0x14f PF: > { %v373_v41 = vld [vmem:[%s1135_s11] sm:$0xff]  ;;  %v374_v42 = vld [vmem:[%s1135_s11 + $0x8] sm:$0xff]  ;;  %952 = vmatprep.mubr.msk.f32.mxu0 %vm235_vm0, %v231_v6  ;;  %v375_v45 = vld [vmem:[%s1135_s11 + $0x10] sm:$0xff]  ;;  %vm625_vm5 = vcmask 130112   ;;  %vm632_vm6 = vcmask 195712   ;;  %vm639_vm7 = vcmask 261312  }
 0x150   : > { %v389_v43 = vmul.f32 %v373_v41, %v1143_v5  ;;  %v390_v44 = vmul.f32 %v374_v42, %v1143_v5  ;;  %v376_v46 = vld [vmem:[%s1135_s11 + $0x18] sm:$0xff]  ;;  %vm1188_vm4 = vmpackc.low %vm235_vm0, %vm235_vm0  ;;  %v391_v48 = vmul.f32 %v375_v45, %v1143_v5  ;;  %v377_v51 = vld [vmem:[%s1135_s11 + $0x20] sm:$0xff]  ;;  %vm646_vm8 = vcmask 326912   ;;  %s888_s25 = sshll.u32 (%p1127_p4), %s1116_s0, 3 }
 0x151   : > { %v392_v49 = vmul.f32 %v376_v46, %v1143_v5  ;;  %v378_v53 = vld [vmem:[%s1135_s11 + $0x28] sm:$0xff]  ;;  %v393_v54 = vmul.f32 %v377_v51, %v1143_v5  ;;  %v379_v62 = vld [vmem:[%s1135_s11 + $0x30] sm:$0xff]  ;;  %v380_v0 = vld [vmem:[%s1135_s11 + $0x38] sm:$0xff]  ;;  %vm653_vm9 = vcmask 392512   ;;  %vm660_vm10 = vcmask 458112   ;;  %s766_s30 = scalar_lea.vmem (%p1127_p4), %s1332_s5, %s888_s25 }
 0x152   : > { %v961_v50 = vpack.c.bf16 %v390_v44, %v389_v43  ;;  %v394_v55 = vmul.f32 %v378_v53, %v1143_v5  ;;  %v405_v56 = vmul.f32 %v389_v43, %v389_v43  ;;  %v407_v57 = vmul.f32 %v391_v48, %v391_v48  ;;  %v381_v9 = vld [vmem:[%s1135_s11 + $0x40] sm:$0xff]  ;;  %v382_v10 = vld [vmem:[%s1135_s11 + $0x48] sm:$0xff]  ;;  %v383_v19 = vld [vmem:[%s1135_s11 + $0x50] sm:$0xff] }
 0x153   : > { %v967_v52 = vpack.c.bf16 %v392_v49, %v391_v48  ;;  %v406_v58 = vmul.f32 %v390_v44, %v390_v44  ;;  %v408_v59 = vmul.f32 %v392_v49, %v392_v49  ;;  %v409_v2 = vmul.f32 %v393_v54, %v393_v54  ;;  %v384_v21 = vld [vmem:[%s1135_s11 + $0x58] sm:$0xff]  ;;  %v385_v28 = vld [vmem:[%s1135_s11 + $0x60] sm:$0xff]  ;;  %v386_v29 = vld [vmem:[%s1135_s11 + $0x68] sm:$0xff] }
 0x154   : > { %963 = vmatprep.subr.msk.bf16.mxu0 %vm1188_vm4, %v961_v50  ;;  %v421_v60 = vsel %vm235_vm0, %v405_v56, 0.0  ;;  %v427_v61 = vsel %vm235_vm0, %v407_v57, 0.0  ;;  %v973_v63 = vpack.c.bf16 %v394_v55, %v393_v54  ;;  %v410_v4 = vmul.f32 %v394_v55, %v394_v55  ;;  %v387_v36 = vld [vmem:[%s1135_s11 + $0x70] sm:$0xff]  ;;  %v388_v38 = vld [vmem:[%s1135_s11 + $0x78] sm:$0xff] }
 0x155   : > { %966 = vmatpush3.bf16.xpose.msk.msra.mxu0 %vm1188_vm4, %v961_v50  ;;  %422 = vadd.xlane.f32.xlu0 %v421_v60  ;;  %v424_v1 = vsel %vm235_vm0, %v406_v58, 0.0  ;;  %v430_v3 = vsel %vm235_vm0, %v408_v59, 0.0  ;;  %v395_v6 = vmul.f32 %v379_v62, %v1143_v5  ;;  %v396_v8 = vmul.f32 %v380_v0, %v1143_v5 }
 0x156   : > { %969 = vmatprep.subr.msk.bf16.mxu0 %vm1188_vm4, %v967_v52  ;;  %428 = vadd.xlane.f32.xlu1 %v427_v61  ;;  %v433_v11 = vsel %vm235_vm0, %v409_v2, 0.0  ;;  %v436_v15 = vsel %vm235_vm0, %v410_v4, 0.0  ;;  %v397_v17 = vmul.f32 %v381_v9, %v1143_v5  ;;  %v398_v18 = vmul.f32 %v382_v10, %v1143_v5 }
 0x157   : > { %v411_v14 = vmul.f32 %v395_v6, %v395_v6  ;;  %v412_v16 = vmul.f32 %v396_v8, %v396_v8  ;;  %v979_v20 = vpack.c.bf16 %v396_v8, %v395_v6  ;;  %v399_v26 = vmul.f32 %v383_v19, %v1143_v5 }
 0x158   : > { %v413_v23 = vmul.f32 %v397_v17, %v397_v17  ;;  %v414_v25 = vmul.f32 %v398_v18, %v398_v18  ;;  %v400_v27 = vmul.f32 %v384_v21, %v1143_v5  ;;  %v401_v34 = vmul.f32 %v385_v28, %v1143_v5 }
 0x159   : > { %425 = vadd.xlane.f32.xlu0 %v424_v1  ;;  %v439_v22 = vsel %vm235_vm0, %v411_v14, 0.0  ;;  %v442_v24 = vsel %vm235_vm0, %v412_v16, 0.0  ;;  %v415_v31 = vmul.f32 %v399_v26, %v399_v26  ;;  %v402_v35 = vmul.f32 %v386_v29, %v1143_v5 }
 0x15a   : > { %431 = vadd.xlane.f32.xlu1 %v430_v3  ;;  %v445_v30 = vsel %vm235_vm0, %v413_v23, 0.0  ;;  %v448_v32 = vsel %vm235_vm0, %v414_v25, 0.0  ;;  %v416_v33 = vmul.f32 %v400_v27, %v400_v27  ;;  %v985_v37 = vpack.c.bf16 %v398_v18, %v397_v17 }
 0x15b   : > { %v451_v39 = vsel %vm235_vm0, %v415_v31, 0.0  ;;  %v417_v40 = vmul.f32 %v401_v34, %v401_v34  ;;  %v418_v42 = vmul.f32 %v402_v35, %v402_v35  ;;  %v403_v43 = vmul.f32 %v387_v36, %v1143_v5 }
 0x15c   : > { %v454_v41 = vsel %vm235_vm0, %v416_v33, 0.0  ;;  %v404_v44 = vmul.f32 %v388_v38, %v1143_v5  ;;  %v991_v50 = vpack.c.bf16 %v400_v27, %v399_v26  ;;  %v997_v5 = vpack.c.bf16 %v402_v35, %v401_v34 }
 0x15d   : > { %972 = vmatpush3.bf16.xpose.msk.msra.mxu0 %vm1188_vm4, %v967_v52  ;;  %434 = vadd.xlane.f32.xlu0 %v433_v11  ;;  %v457_v45 = vsel %vm235_vm0, %v417_v40, 0.0  ;;  %v419_v46 = vmul.f32 %v403_v43, %v403_v43  ;;  %v460_v48 = vsel %vm235_vm0, %v418_v42, 0.0  ;;  %v614_v54 = vlaneseq }
 0x15e   : > { %975 = vmatprep.subr.msk.bf16.mxu0 %vm1188_vm4, %v973_v63  ;;  %437 = vadd.xlane.f32.xlu1 %v436_v15  ;;  %v420_v49 = vmul.f32 %v404_v44, %v404_v44  ;;  %v1003_v53 = vpack.c.bf16 %v404_v44, %v403_v43  ;;  %vm667_vm11 = vcmask 523712   ;;  %vm674_vm12 = vcmask 589312  }
 0x15f   : > { %v463_v51 = vsel %vm235_vm0, %v419_v46, 0.0  ;;  %v1268_v55 = vand.u32 127, %v614_v54  ;;  %v1270_v56 = vshrl.u32 %v614_v54, 7  ;;  %vm681_vm13 = vcmask 654912  }
 0x160   : > { %v466_v52 = vsel %vm235_vm0, %v420_v49, 0.0  ;;  %vm688_vm14 = vcmask 720512   ;;  %vm695_vm15 = vcmask 786112   ;;  %vm709_vm1 = vcmask 917312  }
 0x161   : > { %440 = vadd.xlane.f32.xlu0 %v439_v22  ;;  %v620_v57 = vadd.s32 4294967288, %v1268_v55  ;;  %v627_v59 = vadd.s32 4294967280, %v1268_v55  ;;  %v618_v60 = vsub.s32 %v1268_v55, %v1270_v56  ;;  %v634_v62 = vadd.s32 4294967272, %v1268_v55 }
 0x162   : > { %443 = vadd.xlane.f32.xlu1 %v442_v24  ;;  %v641_v2 = vadd.s32 4294967264, %v1268_v55  ;;  %v648_v9 = vadd.s32 4294967256, %v1268_v55  ;;  %v655_v16 = vadd.s32 4294967248, %v1268_v55  ;;  %v662_v21 = vadd.s32 4294967240, %v1268_v55 }
 0x163   : > { %v623_v61 = vsub.s32 %v620_v57, %v1270_v56  ;;  %v637_v3 = vsub.s32 %v634_v62, %v1270_v56  ;;  %v669_v26 = vadd.s32 4294967232, %v1268_v55  ;;  %v676_v31 = vadd.s32 4294967224, %v1268_v55 }
 0x164   : > { %v644_v10 = vsub.s32 %v641_v2, %v1270_v56  ;;  %v651_v17 = vsub.s32 %v648_v9, %v1270_v56  ;;  %v658_v22 = vsub.s32 %v655_v16, %v1270_v56  ;;  %v665_v27 = vsub.s32 %v662_v21, %v1270_v56 }
 0x165   : > { %978 = vmatpush3.bf16.xpose.msk.msra.mxu0 %vm1188_vm4, %v973_v63  ;;  %446 = vadd.xlane.f32.xlu0 %v445_v30  ;;  %v683_v36 = vadd.s32 4294967216, %v1268_v55  ;;  %v697_v46 = vadd.s32 4294967200, %v1268_v55  ;;  %v718_v62 = vadd.s32 4294967176, %v1268_v55  ;;  %vm716_vm2 = vcmask 982912  }
 0x166   : > { %981 = vmatprep.subr.msk.bf16.mxu0 %vm1188_vm4, %v979_v20  ;;  %449 = vadd.xlane.f32.xlu1 %v448_v32  ;;  %v672_v32 = vsub.s32 %v669_v26, %v1270_v56  ;;  %vm723_vm3 = vcmask 1048512  }
 0x167   : > { %v686_v42 = vsub.s32 %v683_v36, %v1270_v56  ;;  %v721_v2 = vsub.s32 %v718_v62, %v1270_v56 }
 0x169   : > { %452 = vadd.xlane.f32.xlu0 %v451_v39 }
 0x16a   : > { %455 = vadd.xlane.f32.xlu1 %v454_v41  ;;  %v690_v41 = vadd.s32 4294967208, %v1268_v55 }
 0x16d   : > { %984 = vmatpush3.bf16.xpose.msk.msra.mxu0 %vm1188_vm4, %v979_v20  ;;  %458 = vadd.xlane.f32.xlu0 %v457_v45 }
 0x16e   : > { %987 = vmatprep.subr.msk.bf16.mxu0 %vm1188_vm4, %v985_v37  ;;  %461 = vadd.xlane.f32.xlu1 %v460_v48  ;;  %v693_v48 = vsub.s32 %v690_v41, %v1270_v56 }
 0x171   : > { %464 = vadd.xlane.f32.xlu0 %v463_v51 }
 0x172   : > { %467 = vadd.xlane.f32.xlu1 %v466_v52  ;;  %v704_v52 = vadd.s32 4294967192, %v1268_v55 }
 0x175   : > { %990 = vmatpush3.bf16.xpose.msk.msra.mxu0 %vm1188_vm4, %v985_v37  ;;  %v679_v37 = vsub.s32 %v676_v31, %v1270_v56 }
 0x176   : > { %993 = vmatprep.subr.msk.bf16.mxu0 %vm1188_vm4, %v991_v50 }
 0x17d   : > { %996 = vmatpush3.bf16.xpose.msk.msra.mxu0 %vm1188_vm4, %v991_v50 }
 0x17e   : > { %999 = vmatprep.subr.msk.bf16.mxu0 %vm1188_vm4, %v997_v5 }
 0x185   : > { %1002 = vmatpush3.bf16.xpose.msk.msra.mxu0 %vm1188_vm4, %v997_v5  ;;  %v700_v5 = vsub.s32 %v697_v46, %v1270_v56 }
 0x186   : > { %1005 = vmatprep.subr.msk.bf16.mxu0 %vm1188_vm4, %v1003_v53 }
 0x18d   : > { %1008 = vmatpush3.bf16.xpose.msk.msra.mxu0 %vm1188_vm4, %v1003_v53 }
 0x194   : > { %953 = vmatmul.mubr.msk.f32.vlgmr.msra.gmra.mrb[0].mxu0 %vm235_vm0, %v1147_v7  ;;  %v630_v7 = vsub.s32 %v627_v59, %v1270_v56  ;;  %v707_v59 = vsub.s32 %v704_v52, %v1270_v56  ;;  %vm702_vm0 = vcmask 851712  }
 0x1e2   : > { %v423_v58 = vpop.xlane.xlu0 %422 }
 0x1e3   : > { %v429_v47 = vpop.xlane.xlu1 %428  ;;  %v619_v0 = vrot.slane %v423_v58, %v618_v60  ;;  %v711_v58 = vadd.s32 4294967184, %v1268_v55 }
 0x1e4   : > { %v631_v4 = vrot.slane %v429_v47, %v630_v7 }
 0x1e5   : > { %v714_v7 = vsub.s32 %v711_v58, %v1270_v56 }
 0x1e6   : > { %v426_v63 = vpop.xlane.xlu0 %425 }
 0x1e7   : > { %v624_v1 = vrot.slane %v426_v63, %v623_v61  ;;  %v432_v6 = vpop.xlane.xlu1 %431 }
 0x1e8   : > { %v638_v11 = vrot.slane %v432_v6, %v637_v3 }
 0x1e9   : > { %v626_v8 = vsel %vm625_vm5, %v624_v1, %v619_v0 }
 0x1ea   : > { %v435_v14 = vpop.xlane.xlu0 %434  ;;  %v633_v15 = vsel %vm632_vm6, %v631_v4, %v626_v8 }
 0x1eb   : > { %v645_v18 = vrot.slane %v435_v14, %v644_v10  ;;  %v438_v19 = vpop.xlane.xlu1 %437  ;;  %v640_v20 = vsel %vm639_vm7, %v638_v11, %v633_v15 }
 0x1ec   : > { %v652_v23 = vrot.slane %v438_v19, %v651_v17 }
 0x1ed   : > { %v647_v25 = vsel %vm646_vm8, %v645_v18, %v640_v20  ;;  %v746_v18 = vstv %s1153_s18 }
 0x1ee   : > { %v441_v24 = vpop.xlane.xlu0 %440  ;;  %v654_v30 = vsel %vm653_vm9, %v652_v23, %v647_v25 }
 0x1ef   : > { %v659_v28 = vrot.slane %v441_v24, %v658_v22  ;;  %v444_v29 = vpop.xlane.xlu1 %443 }
 0x1f0   : > { %v666_v33 = vrot.slane %v444_v29, %v665_v27 }
 0x1f1   : > { %v661_v35 = vsel %vm660_vm10, %v659_v28, %v654_v30 }
 0x1f2   : > { %v447_v34 = vpop.xlane.xlu0 %446  ;;  %v668_v40 = vsel %vm667_vm11, %v666_v33, %v661_v35 }
 0x1f3   : > { %v673_v38 = vrot.slane %v447_v34, %v672_v32  ;;  %v450_v39 = vpop.xlane.xlu1 %449 }
 0x1f4   : > { %v680_v43 = vrot.slane %v450_v39, %v679_v37 }
 0x1f5   : > { %v675_v45 = vsel %vm674_vm12, %v673_v38, %v668_v40 }
 0x1f6   : > { %v453_v44 = vpop.xlane.xlu0 %452  ;;  %v682_v51 = vsel %vm681_vm13, %v680_v43, %v675_v45 }
 0x1f7   : > { %v687_v49 = vrot.slane %v453_v44, %v686_v42  ;;  %v456_v50 = vpop.xlane.xlu1 %455 }
 0x1f8   : > { %v694_v53 = vrot.slane %v456_v50, %v693_v48 }
 0x1f9   : > { %v689_v57 = vsel %vm688_vm14, %v687_v49, %v682_v51 }
 0x1fa   : > { %v459_v54 = vpop.xlane.xlu0 %458  ;;  %v696_v47 = vsel %vm695_vm15, %v694_v53, %v689_v57 }
 0x1fb   : > { %v701_v60 = vrot.slane %v459_v54, %v700_v5  ;;  %v462_v61 = vpop.xlane.xlu1 %461 }
 0x1fc   : > { %v708_v63 = vrot.slane %v462_v61, %v707_v59 }
 0x1fd   : > { %v703_v1 = vsel %vm702_vm0, %v701_v60, %v696_v47 }
 0x1fe   : > { %v465_v0 = vpop.xlane.xlu0 %464  ;;  %v710_v6 = vsel %vm709_vm1, %v708_v63, %v703_v1 }
 0x1ff   : > { %v715_v3 = vrot.slane %v465_v0, %v714_v7  ;;  %v468_v4 = vpop.xlane.xlu1 %467 }
 0x200   : > { %v722_v8 = vrot.slane %v468_v4, %v721_v2 }
 0x201   : > { %v717_v9 = vsel %vm716_vm2, %v715_v3, %v710_v6 }
 0x202   : > { %v724_v10 = vsel %vm723_vm3, %v722_v8, %v717_v9 }
 0x203   : > { %v739_v55 = vadd.f32 %v724_v10, %v1157_v13  ;;  %v738_v16 = vadd.f32 %v724_v10, %v1155_v12 }
 0x267   : > { %v954_v11 = vpop.f32.mrb[0].mxu0 }
 0x268   : > { %v741_v14 = vmul.f32 2.0, %v954_v11  ;;  %v589_v15 = vpop.f32.mrb[1].mxu0 }
 0x269   : > { %v740_v17 = vmul.f32 2.0, %v589_v15 }
 0x26a   : > { %v743_v56 = vsub.f32 %v739_v55, %v741_v14 }
 0x26b   : > { %v742_v19 = vsub.f32 %v738_v16, %v740_v17 }
 0x26c   : > { %v745_v20 = vmax.f32 %v743_v56, 0.0 }
 0x26d   : > { %v744_v21 = vmax.f32 %v742_v19, 0.0 }
 0x26e   : > { %v748_v22 = vsub.f32 %v746_v18, %v745_v20 }
 0x26f   : > { %v747_v23 = vsub.f32 %v746_v18, %v744_v21 }
 0x270   : > { %v751_v24 = vmul.f32 1.442695, %v748_v22 }
 0x271   : > { %v749_v25 = vmul.f32 1.442695, %v747_v23 }
 0x272   : > { %1041 = vpow2.f32 %v751_v24 }
 0x273   : > { %1043 = vpow2.f32 %v749_v25 }
 0x278   : > { %764 = sbr.rel (!%p1127_p4) target bundleno = 647 (0x287), region = 48 }
 0x27c   : > { %v1042_v26 = vpop.eup %1041 }
 0x27d   : > { %v1044_v13 = vpop.eup %1043  ;;  %754 = vst [vmem:[%s1159_s19 + $0x8] sm:$0xff] %v1042_v26 }
 0x27e   : > { %753 = vst [vmem:[%s1159_s19] sm:$0xff] %v1044_v13 }
 0x284   : > { %v798_v27 = vld [vmem:[%s1159_s19 + $0x8] sm:$0xff] }
 0x285   : > { %v796_v12 = vld [vmem:[%s1159_s19] sm:$0xff]  ;;  %799 = vst [vmem:[%s766_s30 + $0x10] sm:$0xff] %v798_v27 }
 0x286   : > { %797 = vst [vmem:[%s766_s30] sm:$0xff] %v796_v12 }
 0x287 PF: > { %p15_p9 = scmp.ge.s32.totalorder %s1118_s1, 4   ;;  %s1336_s22 = smov %s1063_s23 }
 0x288   : > { %s1337_s23 = smov %s1125_s27  ;;  %s1338_s24 = smov %s1118_s1 }
 0x289   :  { %17 = sbr.rel (!%p15_p9) target bundleno = 5 (0x5), region = 116 }

// kernel: sparse_gp_forward.3
= control target key start
LH: loop header
LB: loop body
LE: loop exit
PB: predicated region body
PF: predicated region fallthrough
CT: control target
= control target key end

     0   :  { %s1274_s0 = inlined_call_operand.<no memory space> [shape: f32[1], index: 0, kind: input, shape index: {}]   ;;  %s1275_s1 = inlined_call_operand.vmem [shape: f32[16,256], index: 1, kind: input, shape index: {}]   ;;  %s1276_s2 = inlined_call_operand.vmem [shape: f32[3,16], index: 2, kind: input, shape index: {}]   ;;  %s1277_s3 = inlined_call_operand.vmem [shape: f32[3,16,16], index: 3, kind: input, shape index: {}]   ;;  %s1278_s4 = inlined_call_operand.vmem [shape: f32[16,16], index: 4, kind: input, shape index: {}]   ;;  %s1279_s5 = inlined_call_operand.vmem [shape: f32[3,256], index: 5, kind: output, shape index: {0}]   ;;  %s1280_s6 = inlined_call_operand.hbm [shape: f32[3,256], index: 6, kind: output, shape index: {1}]  }
   0x1   :  { %12 = sst [smem:[#allocation2]] %s1274_s0 }
   0x2   :  { %13 = vsyncpa [#allocation5], 0 }
   0x3   :  { %15 = vsyncpa [#allocation5 + $0x1], 0  ;;  %s1123_s23 = smov 0   ;;  %s1125_s24 = smov 0  }
   0x4   :  { %s1127_s25 = smov 0   ;;  %s1129_s26 = smov 0  }
   0x5 LB: > { %s1144_s0 = sadd.s32 4294967295, %s1079_s26   ;;  %s872_s27 = sadd.s32 4294967294, %s1079_s26   ;;  %s1079_s26 = sphi %s1129_s26, %s1286_s26   ;;  %s1075_s25 = sphi %s1127_s25, %s1285_s25   ;;  %s1071_s24 = sphi %s1125_s24, %s1284_s24   ;;  %s1067_s23 = sphi %s1123_s23, %s1283_s23  }
   0x6   : > { %s1148_s28 = sadd.s32 1, %s1079_s26   ;;  %s49_s29 = sadd.s32 1, %s1075_s25 }
   0x7   : > { %s46_s30 = ssub.s32 %s1079_s26, %s1148_s28  ;;  %p56_p0 = scmp.ne.s32.totalorder %s1075_s25, %s1071_s24 }
   0x8   : > { %p47_p1 = scmp.eq.s32.totalorder %s46_s30, 0  ;;  %p57_p2 = scmp.eq.s32.totalorder %s1079_s26, 0 }
   0x9   : > { %p175_p3 = scmp.eq.s32.totalorder %s1144_s0, 1  ;;  %p180_p4 = scmp.ne.s32.totalorder %s1071_s24, %s1067_s23 }
   0xa   : > { %s1160_s7 = scalar_select %p47_p1, %s1075_s25, %s49_s29  }
   0xb   : > { %p58_p5 = por %p57_p2, %p56_p0  ;;  %p1162_p6 = por %p175_p3, %p56_p0 }
   0xc   : > { %p181_p7 = scmp.eq.s32.totalorder %s872_s27, 1  ;;  %p874_p9 = scmp.ge.s32.totalorder %s1079_s26, 2 }
   0xe   : > { %p1166_p8 = por %p181_p7, %p180_p4  ;;  %209 = sbr.rel (%p874_p9) target bundleno = 28 (0x1c), region = 32 }
  0x15   : > { %212 = sbr.rel (!%p58_p5) target bundleno = 28 (0x1c), region = 36  ;;  %s214_s10 = sand.u32 (%p58_p5), 1, %s1075_s25  }
  0x16   : > { %s876_s11 = sshll.u32 (%p58_p5), %s1079_s26, 3  ;;  %s875_s12 = sshll.u32 (%p58_p5), %s214_s10, 4 }
  0x17   : > { %s218_s15 = scalar_lea.vmem (%p58_p5), %s1275_s1, %s876_s11  ;;  %s216_s16 = scalar_lea.vmem (%p58_p5), [#allocation3], %s875_s12 }
  0x18   : > { %v248_v0 = vld [vmem:[%s218_s15] sm:$0xff] (%p58_p5)  ;;  %v250_v1 = vld [vmem:[%s218_s15 + $0x10] sm:$0xff] (%p58_p5) }
  0x19   : > { %249 = vst [vmem:[%s216_s16] sm:$0xff] (%p58_p5), %v248_v0  ;;  %251 = vst [vmem:[%s216_s16 + $0x8] sm:$0xff] (%p58_p5), %v250_v1 }
  0x1c PF: > { %p877_p10 = scmp.ge.s32.totalorder %s1079_s26, 1  ;;  %p256_p11 = scmp.lt.s32.totalorder %s1079_s26, 3 }
  0x1e   : > { %p257_p12 = pnand %p877_p10, %p256_p11 }
  0x1f   : > { %s1181_s17 = sand.u32 (!%p257_p12), 1, %s1071_s24   ;;  %v1081_v2 = vmov (!%p257_p12), 0.0|0.0   ;;  %vm1082_vm0 = vmmov (!%p257_p12), 0   ;;  %v1083_v3 = vmov (!%p257_p12), 0.0   ;;  %vm305_vm1 = vcmask (!%p257_p12), 130048   ;;  %v302_v4 = vld [vmem:[%s1278_s4] sm:$0xff] (!%p257_p12) }
  0x20   : > { %260 = sbr.rel (%p257_p12) target bundleno = 296 (0x128), region = 74  ;;  %952 = vmatprep.subr.bf16.mxu0 (!%p257_p12), %v1081_v2  ;;  %s878_s18 = sshll.u32 (!%p257_p12), %s1181_s17, 4  ;;  %921 = vmatprep.mubr.msk.f32.mxu0 (!%p257_p12), %vm1082_vm0, %v1083_v3  ;;  %v304_v8 = vld [vmem:[%s1276_s2] sm:$0x7] (!%p257_p12)  ;;  %v303_v9 = vld [vmem:[%s1278_s4 + $0x8] sm:$0xff] (!%p257_p12)  ;;  %v886_v12 = vld [vmem:[%s1277_s3 + $0x10] sm:$0xff] (!%p257_p12) }
  0x21   : > { %928 = vmatprep.mubr.msk.f32.mxu1 (!%p257_p12), %vm305_vm1, %v302_v4  ;;  %s470_s21 = sld [smem:[#allocation2]] (!%p257_p12)  ;;  %s265_s22 = scalar_lea.vmem (!%p257_p12), [#allocation3], %s878_s18  ;;  %v476_v10 = vld [vmem:[%s1277_s3] sm:$0xff] (!%p257_p12)  ;;  %v477_v14 = vld [vmem:[%s1277_s3 + $0x8] sm:$0xff] (!%p257_p12)  ;;  %v887_v15 = vld [vmem:[%s1277_s3 + $0x18] sm:$0xff] (!%p257_p12)  ;;  %vm754_vm2 = vcmask (!%p257_p12), 1040384  }
  0x22   : > { %v300_v5 = vld [vmem:[%s265_s22] sm:$0xff] (!%p257_p12)  ;;  %v301_v6 = vld [vmem:[%s265_s22 + $0x8] sm:$0xff] (!%p257_p12)  ;;  %p296_p13 = scmp.lt.s32.totalorder (!%p257_p12), %s1144_s0, 1  ;;  %s879_s14 = sshll.u32 (!%p257_p12), %s1181_s17, 2  ;;  %vm756_vm3 = vcmask (!%p257_p12), 1041408  }
  0x23   : > { %v953_v7 = vpack.c.bf16 (!%p257_p12), %v301_v6, %v300_v5  ;;  %v890_v16 = vld [vmem:[%s1277_s3 + $0x20] sm:$0xff] (!%p257_p12)  ;;  %v891_v17 = vld [vmem:[%s1277_s3 + $0x28] sm:$0xff] (!%p257_p12)  ;;  %s895_s16 = sshll.u32 (!%p257_p12), %s1144_s0, 6  ;;  %s295_s18 = scalar_lea.vmem (!%p257_p12), [#allocation4], %s879_s14 }
  0x24   : > { %s783_s19 = sshll.u32 (!%p257_p12), %s295_s18, 4  ;;  %s1230_s22 = scalar_lea.hbm (!%p257_p12), %s1280_s6, %s895_s16  ;;  %s1232_s19 = int_to_ptr.vmem [resolvable:$true] %s783_s19 }
  0x25   : > { %954 = vmatpush3.bf16.msra.mxu0 (!%p257_p12), %v953_v7  ;;  %956 = vmatprep.subr.bf16.mxu1 (!%p257_p12), %v953_v7  ;;  %s767_s27 = scalar_lea.sflag (!%p257_p12), [#allocation5], %s1181_s17 }
  0x26   : > { %958 = vmatpush3.bf16.msra.mxu1 (!%p257_p12), %v953_v7  ;;  %960 = vmatprep.subr.bf16.mxu0 (!%p257_p12), %v953_v7 }
  0x27   : > { %964 = vmatprep.subr.bf16.mxu1 %v953_v7  ;;  %v471_v11 = vstv %s470_s21  ;;  %s297_s29 = scalar_select %p296_p13, %s1144_s0, 1 }
  0x28   : > { %922 = vmatmul.mubr.msk.f32.vlgmr.msra.gmra.mrb[0].mxu0 %vm305_vm1, %v304_v8  ;;  %v472_v13 = vmul.f32 1.442695, %v471_v11  ;;  %s1084_s0 = smov [#allocation4]  }
  0x29   : > { %929 = vmatmul.mubr.msk.f32.vlgmr.msra.gmra.mrb[0].mxu1 %vm305_vm1, %v303_v9  ;;  %962 = vmatpush3.bf16.msra.mxu0 %v953_v7  ;;  %s880_s30 = sshll.u32 %s297_s29, 2  ;;  %s1017_s29 = scalar_lea.vmem %s1232_s19, 64 }
  0x2a   : > { %966 = vmatpush3.bf16.msra.mxu1 %v953_v7  ;;  %935 = vmatprep.mubr.msk.f32.mxu0 %vm305_vm1, %v476_v10  ;;  %1015 = vpow2.f32 %v472_v13  ;;  %s299_s12 = scalar_lea.vmem %s1279_s5, %s880_s30  ;;  %p1018_p0 = scmp.ne.s32.totalorder %s1232_s19, %s1017_s29 }
  0x2b   : > { %942 = vmatprep.mubr.msk.f32.mxu1 %vm305_vm1, %v886_v12  ;;  %968 = vmatprep.subr.bf16.mxu0 %v953_v7  ;;  %s1021_s30 = sshll.u32 %s1084_s0, 4  ;;  %s1022_s30 = int_to_ptr.vmem [resolvable:$false] %s1021_s30 }
  0x2c   : > { %936 = vmatmul.mubr.msk.f32.vlgmr.msra.gmra.mrb[2].mxu0 %vm305_vm1, %v477_v14  ;;  %p1019_p1 = pnand %p1018_p0, %p1162_p6  ;;  %s1023_s10 = scalar_lea.vmem %s1022_s30, 128 }
  0x2d   : > { %943 = vmatmul.mubr.msk.f32.vlgmr.msra.gmra.mrb[2].mxu1 %vm305_vm1, %v887_v15  ;;  %970 = vmatpush3.bf16.msra.mxu0 %v953_v7  ;;  %p1024_p3 = scmp.lt.s32.totalorder %s1232_s19, %s1022_s30  ;;  %p1025_p4 = scmp.lt.s32.totalorder %s1023_s10, %s1017_s29 }
  0x2e   : > { %949 = vmatprep.mubr.msk.f32.mxu0 %vm305_vm1, %v890_v16  ;;  %p1020_p2 = pneg %p1019_p1 }
  0x2f   : > { %p1026_p5 = por %p1025_p4, %p1024_p3 }
  0x30   : > { %950 = vmatmul.mubr.msk.f32.vlgmr.msra.gmra.mrb[4].mxu0 %vm305_vm1, %v891_v17 }
  0x31   : > { %p1027_p7 = pnand %p1026_p5, %p1020_p2 }
  0x34   : > { %v1016_v18 = vpop.eup %1015 }
  0x35   : > { %971 = vpush %v1016_v18 }
  0x66   : > { %s972_s13 = spop %971 }
  0x67   : > { %s475_s15 = sadd.f32 2e-06, %s972_s13 }
  0x69   : > { %v759_v3 = vstv %s475_s15 }
  0xfb   : > { %v375_v19 = vpop.f32.mrb[0].mxu0 }
  0xfc   : > { %379 = vst [vmem:[%s299_s12] sm:$0x7] %v375_v19  ;;  %v923_v20 = vpop.f32.mrb[1].mxu0  ;;  %v930_v21 = vpop.f32.mrb[0].mxu1 }
  0xfd   : > { %v462_v22 = vmul.f32 %v930_v21, %v301_v6  ;;  %v452_v23 = vpop.f32.mrb[1].mxu1 }
  0xfe   : > { %v461_v24 = vmul.f32 %v452_v23, %v300_v5 }
  0xff   : > { %v937_v25 = vpop.f32.mrb[2].mxu0 }
 0x100   : > { %v463_v26 = vadd.f32 %v462_v22, %v461_v24  ;;  %v560_v27 = vmul.f32 %v937_v25, %v937_v25  ;;  %v550_v28 = vpop.f32.mrb[3].mxu0  ;;  %v944_v29 = vpop.f32.mrb[2].mxu1 }
 0x101   : > { %v559_v30 = vmul.f32 %v550_v28, %v550_v28  ;;  %v653_v31 = vmul.f32 %v944_v29, %v944_v29  ;;  %v643_v32 = vpop.f32.mrb[3].mxu1 }
 0x102   : > { %v464_v33 = vrot.slane %v463_v26, 4  ;;  %v652_v34 = vmul.f32 %v643_v32, %v643_v32 }
 0x103   : > { %v561_v35 = vadd.f32 %v560_v27, %v559_v30  ;;  %v951_v36 = vpop.f32.mrb[4].mxu0 }
 0x104   : > { %v465_v37 = vadd.f32 %v464_v33, %v463_v26  ;;  %v654_v38 = vadd.f32 %v653_v31, %v652_v34  ;;  %v746_v39 = vmul.f32 %v951_v36, %v951_v36  ;;  %v736_v40 = vpop.f32.mrb[5].mxu0 }
 0x105   : > { %v562_v41 = vrot.slane %v561_v35, 4  ;;  %v745_v42 = vmul.f32 %v736_v40, %v736_v40 }
 0x106   : > { %v655_v43 = vrot.slane %v654_v38, 4  ;;  %v466_v46 = vrot.slane %v465_v37, 2 }
 0x107   : > { %v563_v44 = vadd.f32 %v562_v41, %v561_v35  ;;  %v747_v45 = vadd.f32 %v746_v39, %v745_v42 }
 0x108   : > { %v656_v47 = vadd.f32 %v655_v43, %v654_v38  ;;  %v467_v53 = vadd.f32 %v466_v46, %v465_v37 }
 0x109   : > { %v564_v48 = vrot.slane %v563_v44, 2  ;;  %v748_v49 = vrot.slane %v747_v45, 4 }
 0x10a   : > { %v657_v50 = vrot.slane %v656_v47, 2  ;;  %v468_v61 = vrot.slane %v467_v53, 1 }
 0x10b   : > { %v565_v51 = vadd.f32 %v564_v48, %v563_v44  ;;  %v749_v52 = vadd.f32 %v748_v49, %v747_v45 }
 0x10c   : > { %v658_v54 = vadd.f32 %v657_v50, %v656_v47  ;;  %v469_v1 = vadd.f32 %v468_v61, %v467_v53 }
 0x10d   : > { %v566_v55 = vrot.slane %v565_v51, 1  ;;  %v750_v56 = vrot.slane %v749_v52, 2 }
 0x10e   : > { %v659_v57 = vrot.slane %v658_v54, 1 }
 0x10f   : > { %v567_v58 = vadd.f32 %v566_v55, %v565_v51  ;;  %v751_v59 = vadd.f32 %v750_v56, %v749_v52 }
 0x110   : > { %v660_v60 = vadd.f32 %v659_v57, %v658_v54 }
 0x111   : > { %v752_v62 = vrot.slane %v751_v59, 1 }
 0x112   : > { %v755_v63 = vsel %vm754_vm2, %v567_v58, %v660_v60 }
 0x113   : > { %v753_v0 = vadd.f32 %v752_v62, %v751_v59 }
 0x115   : > { %v757_v2 = vsel %vm756_vm3, %v755_v63, %v753_v0 }
 0x116   : > { %v758_v4 = vsub.f32 %v757_v2, %v469_v1 }
 0x118   : > { %v760_v5 = vadd.f32 %v759_v3, %v758_v4 }
 0x11a   : > { %761 = vst [vmem:[%s295_s18] sm:$0x7] %v760_v5 }
 0x11b   : > { %1030 = shalt.err (!%p1027_p7)
}
 0x11c   : > { %s1031_s17 = scalar_lea.hbm %s1230_s22, 64  ;;  %s1035_s13 = scalar_lea.hbm %s1280_s6, 128 }
 0x11d   : > { %p1032_p10 = scmp.ne.s32.totalorder %s1230_s22, %s1031_s17  ;;  %p1036_p13 = scmp.lt.u32.totalorder %s1230_s22, %s1280_s6 }
 0x11e   : > { %p1037_p0 = scmp.lt.u32.totalorder %s1035_s13, %s1031_s17  ;;  %p1039_p2 = scmp.lt.u32.totalorder %s1031_s17, %s1230_s22 }
 0x11f   : > { %p1033_p11 = pnand %p1032_p10, %p1162_p6 }
 0x120   : > { %p1038_p1 = por %p1037_p0, %p1036_p13 }
 0x121   : > { %p1034_p12 = pneg %p1033_p11 }
 0x122   : > { %p1040_p3 = por %p1039_p2, %p1038_p1 }
 0x124   : > { %p1041_p4 = pnand %p1040_p3, %p1034_p12 }
 0x126   : > { %1044 = shalt.err (!%p1041_p4)
}
 0x127   : > { %973 = dma.vmem_to_hbm [thread:$0]  (%p1162_p6), %s1232_s19, 64, %s1230_s22, %s767_s27  }
 0x128 PF: > { %s802_s16 = sand.u32 1, %s1067_s23   ;;  %p976_p5 = pnand %p874_p9, %p1166_p8 }
 0x129   : > { %s803_s18 = scalar_lea.sflag [#allocation5], %s802_s16 }
 0x12a   : > { %1062 = dma.done.wait (!%p976_p5), %s803_s18, 64  }
 0x12b   : > { %1064 = vsyncadd (!%p976_p5), %s803_s18, 4294967232  ;;  %p18_p7 = scmp.ge.s32.totalorder %s1148_s28, 4   ;;  %s1283_s23 = smov %s1071_s24 }
 0x12c   : > { %s1284_s24 = smov %s1075_s25  ;;  %s1285_s25 = smov %s1160_s7 }
 0x12d   : > { %s1286_s26 = smov %s1148_s28  ;;  %20 = sbr.rel (!%p18_p7) target bundleno = 5 (0x5), region = 132 }
 0x134   :  { %808 = vsyncpa [#allocation5], 1 }
 0x135   :  { %810 = vsyncpa [#allocation5 + $0x1], 1 }

</bundles_post_ra>
